<compile_context>
chip_gen: v7x
topology: tpu7x:2x2x1
jax: 0.10.0
libtpu: 0.0.40
codegen_flags: <defaults>
</compile_context>

<pallas_src>
import functools
import math

import jax
import jax.numpy as jnp
from jax.experimental import pallas as pl
from jax.experimental.pallas import tpu as pltpu


def _round_up(x, m):
    return (x + m - 1) // m * m


# ----------------------------- Pallas kernels -------------------------------
def _mask_taps_kernel(p_ref, w1_ref, b1_ref, wt_ref, a1_ref, o_ref):
    """PReLU(p @ w1 + b1) @ wt -> all 9 deconv taps per coarse pixel (bf16 out)."""
    m = jnp.dot(p_ref[...], w1_ref[...], preferred_element_type=jnp.float32)
    m = m + b1_ref[...]
    a1 = a1_ref[...]                                  # (1,1) learned PReLU alpha
    m = jnp.where(m >= 0.0, m, m * a1)
    taps = jnp.dot(m.astype(jnp.bfloat16), wt_ref[...],
                   preferred_element_type=jnp.float32)
    o_ref[...] = taps.astype(jnp.bfloat16)            # bf16 intermediate (halved HBM)


def _mask_apply_body_kernel(lg_ref, xp_ref, xr_ref, bd_ref, w3t_ref, b3_ref,
                            a3_ref, o_ref, patches_ref, *, tH, W, C, k):
    """Softmax2d(logits)*x -> 3x3 conv (transposed matmul) + bias + PReLU + res.

    lg_ref / xp_ref hold one halo row-window (1, 1, tH+2, W+2, C); the conv's
    zero padding is implicit because the x halo is zero (mask * 0 == 0).
    xr_ref holds the residual x for this tile in lane-packed (C, tH*W) form.
    """
    M = tH * W
    lg = lg_ref[0, 0].astype(jnp.float32) + bd_ref[...].reshape(1, 1, C)
    # Softmax2d == per-pixel softmax over channels (exp + approx recip -> EUP).
    mx = jnp.max(lg, axis=-1, keepdims=True)
    e = jnp.exp(lg - mx)
    s = jnp.sum(e, axis=-1, keepdims=True)
    mask = e * pl.reciprocal(s, approx=True)
    res = (mask * xp_ref[0, 0].astype(jnp.float32)).astype(jnp.bfloat16)
    # In-VMEM im2col written straight into a bf16 scratch (no f32 concatenate).
    # K-order is (kh, kw, cin) to match w3t's column order.
    for kh in range(k):
        for kw in range(k):
            i = kh * k + kw
            patches_ref[:, i * C:(i + 1) * C] = (
                res[kh:kh + tH, kw:kw + W, :].reshape(M, C))
    # Transposed body matmul: (C, 9C) x (M, 9C)^T -> (C, M).  Pixels land in
    # lanes, so the epilogue and the store are lane-dense (M % 128 == 0).
    y = jax.lax.dot_general(w3t_ref[...], patches_ref[...],
                            (((1,), (1,)), ((), ())),
                            preferred_element_type=jnp.float32)
    y = y + b3_ref[...]                               # (C,1) bias over lanes
    a3 = a3_ref[...]
    y = jnp.where(y >= 0.0, y, y * a3)                # PReLU (lane-dense)
    o_ref[0, 0] = y + xr_ref[0, 0]                    # residual add, f32 store


# ----------------------------- pallas_call drivers ---------------------------
def _mask_and_taps(p1_bf16, w1_bf16, b1, wt_bf16, a1):
    """Row-tiled fused call: mask_conv (+PReLU) and the 16 -> 9*C tap matmul."""
    R, K = p1_bf16.shape
    Nt = wt_bf16.shape[1]
    # Bigger tile (<=512) amortizes the ~0.35us per-step overhead; working set
    # at 512x288 bf16 is ~1.2 MiB double-buffered, far under every VMEM limit.
    tm = min(512, _round_up(R, 16))
    Rp = _round_up(R, tm)
    if Rp != R:
        p1_bf16 = jnp.pad(p1_bf16, ((0, Rp - R), (0, 0)))
    out = pl.pallas_call(
        _mask_taps_kernel,
        out_shape=jax.ShapeDtypeStruct((Rp, Nt), jnp.bfloat16),
        grid_spec=pltpu.PrefetchScalarGridSpec(
            num_scalar_prefetch=0,
            grid=(Rp // tm,),
            in_specs=[
                pl.BlockSpec((tm, K), lambda i: (i, 0)),
                pl.BlockSpec(w1_bf16.shape, lambda i: (0, 0)),
                pl.BlockSpec(b1.shape, lambda i: (0, 0)),
                pl.BlockSpec(wt_bf16.shape, lambda i: (0, 0)),
                pl.BlockSpec(a1.shape, lambda i: (0, 0)),
            ],
            out_specs=pl.BlockSpec((tm, Nt), lambda i: (i, 0)),
        ),
        compiler_params=pltpu.CompilerParams(
            dimension_semantics=("parallel",)),
    )(p1_bf16, w1_bf16, b1, wt_bf16, a1)
    # Keep the [:R] slice — padded rows hold garbage taps (bias-fed PReLU).
    return out[:R]


def _choose_row_tile(B, H, W, C, pad, k, budget_bytes=16 * 1024 * 1024):
    """Largest row tile whose kernel-B working set fits a v7x-safe VMEM budget."""
    Wp = W + 2 * pad

    def est(tH):
        Hs = tH + 2 * pad
        b_in = 2 * 2 * (Hs * Wp * C * 2)       # lg_win + xp_win, bf16, double-buffered
        b_tmp = 4 * (Hs * Wp * C * 4)          # f32 softmax / mask temporaries
        b_pat = tH * W * k * k * C * 2         # bf16 im2col scratch
        b_out = 2 * 2 * (tH * W * C * 4)       # xres in + out, f32, double-buffered
        return b_in + b_tmp + b_pat + b_out

    divisors = [d for d in range(1, H + 1) if H % d == 0]
    fit = [d for d in divisors if est(d) <= budget_bytes] or [1]
    tH = max(fit)
    # Give v7x's two TensorCores (and the pipeline) >= ~4 grid steps.
    if B * (H // tH) < 4:
        better = [d for d in fit if B * (H // d) >= 4]
        if better:
            tH = max(better)
    return tH


def _mask_apply_body(lg_win, xp_win, xres, bd, w3t_bf16, b3, a3, *,
                     tH, W, C, k):
    """Row-tiled fused softmax + mask*x + 3x3 conv + PReLU + residual."""
    B, nT, Hs, Wp, _ = lg_win.shape
    M = tH * W
    kernel = functools.partial(_mask_apply_body_kernel, tH=tH, W=W, C=C, k=k)
    return pl.pallas_call(
        kernel,
        out_shape=jax.ShapeDtypeStruct((B, nT, C, M), jnp.float32),
        grid_spec=pltpu.PrefetchScalarGridSpec(
            num_scalar_prefetch=0,
            grid=(B, nT),
            in_specs=[
                pl.BlockSpec((1, 1, Hs, Wp, C), lambda b, t: (b, t, 0, 0, 0)),
                pl.BlockSpec((1, 1, Hs, Wp, C), lambda b, t: (b, t, 0, 0, 0)),
                pl.BlockSpec((1, 1, C, M), lambda b, t: (b, t, 0, 0)),
                pl.BlockSpec(bd.shape, lambda b, t: (0, 0)),
                pl.BlockSpec(w3t_bf16.shape, lambda b, t: (0, 0)),
                pl.BlockSpec(b3.shape, lambda b, t: (0, 0)),
                pl.BlockSpec(a3.shape, lambda b, t: (0, 0)),
            ],
            out_specs=pl.BlockSpec((1, 1, C, M), lambda b, t: (b, t, 0, 0)),
            scratch_shapes=[pltpu.VMEM((M, k * k * C), jnp.bfloat16)],
        ),
        compiler_params=pltpu.CompilerParams(
            dimension_semantics=("parallel", "parallel"),
            vmem_limit_bytes=32 * 1024 * 1024),   # explicit, sized to the tile
    )(lg_win, xp_win, xres, bd, w3t_bf16, b3, a3)


# ----------------------------- plain-JAX glue --------------------------------
def _extract_patches(xp, k, stride):
    """im2col on an already-padded NHWC tensor; K-dim order is (kh, kw, c)."""
    B, Hp, Wp, C = xp.shape
    Ho = (Hp - k) // stride + 1
    Wo = (Wp - k) // stride + 1
    cols = []
    for kh in range(k):
        for kw in range(k):
            cols.append(
                xp[:, kh:kh + stride * (Ho - 1) + 1:stride,
                      kw:kw + stride * (Wo - 1) + 1:stride, :])
    pat = jnp.stack(cols, axis=3)          # (B, Ho, Wo, k*k, C)
    return pat.reshape(B * Ho * Wo, k * k * C), Ho, Wo


# ----------------------------- forward pass ----------------------------------
def joint_attention_forward(x_nchw, params, *, n_feats, kernel_size=3):
    B, C, H, W = x_nchw.shape
    assert C == n_feats
    k = kernel_size
    pad = k // 2
    stride = 4
    # The dense-tap deconv rewrite relies on each output pixel seeing <= 1 tap.
    assert stride >= k, "deconv rewrite requires stride >= kernel_size"

    x = jnp.transpose(x_nchw, (0, 2, 3, 1)).astype(jnp.float32)      # NHWC
    xp = jnp.pad(x, ((0, 0), (pad, pad), (pad, pad), (0, 0)))        # zero halo

    a1 = params["alpha1"].reshape(1, 1).astype(jnp.float32)
    a3 = params["alpha3"].reshape(1, 1).astype(jnp.float32)

    # ---- kernel A: mask_conv (Conv2d n_feats->16, stride 4, pad 1, PReLU)
    #      fused with the ConvTranspose2d tap matmul (16 -> k*k*n_feats) ----
    p1, Ho, Wo = _extract_patches(xp, k, stride)
    wt = jnp.transpose(params["wd"], (2, 0, 1, 3)).reshape(16, k * k * n_feats)
    taps = _mask_and_taps(
        p1.astype(jnp.bfloat16),
        params["w1"].reshape(k * k * n_feats, 16).astype(jnp.bfloat16),
        params["b1"].reshape(1, 16).astype(jnp.float32),
        wt.astype(jnp.bfloat16),
        a1,
    ).reshape(B, Ho, Wo, k, k, n_feats)                      # bf16 taps

    # Sanity: output_size = x.size() must be reachable by ConvTranspose2d.
    for dim_out, dim_in in ((H, Ho), (W, Wo)):
        opad = dim_out - ((dim_in - 1) * stride - 2 * pad + k)
        assert 0 <= opad < stride, "output_size not reachable by ConvTranspose2d"

    # ---- glue: STATIC ConvTranspose2d tap placement (pad -> transpose ->
    #      reshape -> crop; no dynamic gather).  Row r of `placed` is padded
    #      output row r (= output row r - pad); rows/cols that receive no tap
    #      (incl. the output_padding fringe) are zero -> bias only in kernel B.
    #      Halo rows may hold real tap values, which is harmless: they are
    #      multiplied by the zero x-halo inside kernel B. ----
    ph, pw = H + 2 * pad, W + 2 * pad
    placed = jnp.pad(taps, ((0, 0), (0, 0), (0, 0),
                            (0, stride - k), (0, stride - k), (0, 0)))
    placed = placed.transpose(0, 1, 3, 2, 4, 5).reshape(
        B, stride * Ho, stride * Wo, n_feats)
    placed = jnp.pad(placed, ((0, 0), (0, max(0, ph - stride * Ho)),
                              (0, max(0, pw - stride * Wo)), (0, 0)))
    logits_pad = placed[:, :ph, :pw, :]                       # bf16 (B,ph,pw,C)

    # ---- spatial row tiling + halo windows for kernel B ----
    tH = _choose_row_tile(B, H, W, n_feats, pad, k)
    nT = H // tH
    Hs = tH + 2 * pad
    lg_win = jnp.stack([logits_pad[:, t * tH:t * tH + Hs] for t in range(nT)],
                       axis=1)                                # bf16
    # mask*x only feeds the bf16 MXU conv, so x can travel in bf16 here; the
    # residual path below stays f32.
    xp_win = jnp.stack([xp[:, t * tH:t * tH + Hs] for t in range(nT)],
                       axis=1).astype(jnp.bfloat16)
    # Residual x in lane-packed (C, tH*W) layout (no in-kernel slice+reshape).
    xres = (x_nchw.astype(jnp.float32)
            .reshape(B, n_feats, nT, tH, W)
            .transpose(0, 2, 1, 3, 4)
            .reshape(B, nT, n_feats, tH * W))

    # ---- kernel B: Softmax2d + mask*x + conv_body(3x3) + PReLU + residual ---
    w3t = jnp.transpose(params["w3"], (3, 0, 1, 2)).reshape(
        n_feats, k * k * n_feats)
    out = _mask_apply_body(
        lg_win, xp_win, xres,
        params["bd"].reshape(1, n_feats).astype(jnp.float32),
        w3t.astype(jnp.bfloat16),
        params["b3"].reshape(n_feats, 1).astype(jnp.float32),
        a3,
        tH=tH, W=W, C=n_feats, k=k)
    # (B, nT, C, tH*W) -> NCHW (the kernel output is already channel-major).
    out = (out.reshape(B, nT, n_feats, tH, W)
           .transpose(0, 2, 1, 3, 4)
           .reshape(B, n_feats, H, W))
    return out


# ----------------------------- parameter init --------------------------------
def init_params(key, n_feats, k=3):
    """Deterministic synthetic init (PyTorch-style uniform(-1/sqrt(fan_in)))."""
    ks = jax.random.split(key, 6)

    def u(kk, shape, fan_in):
        bound = 1.0 / math.sqrt(fan_in)
        return jax.random.uniform(kk, shape, jnp.float32, -bound, bound)

    return {
        # conv weights stored in HWIO layout (kh, kw, cin, cout)
        "w1": u(ks[0], (k, k, n_feats, 16), k * k * n_feats),
        "b1": u(ks[1], (16,), k * k * n_feats),
        # ConvTranspose2d weight, stored as (kh, kw, cin=16, cout=n_feats)
        "wd": u(ks[2], (k, k, 16, n_feats), k * k * 16),
        "bd": u(ks[3], (n_feats,), k * k * 16),
        "w3": u(ks[4], (k, k, n_feats, n_feats), k * k * n_feats),
        "b3": u(ks[5], (n_feats,), k * k * n_feats),
        # nn.PReLU() default init (single shared parameter), passed at runtime.
        "alpha1": jnp.array(0.25, jnp.float32),
        "alpha3": jnp.array(0.25, jnp.float32),
    }


if __name__ == "__main__":
    key = jax.random.PRNGKey(0)
    kx, kp = jax.random.split(key)

    n_feats = 32          # small but consistent with the module's constructor
    B, H, W = 2, 16, 16
    x = jax.random.normal(kx, (B, n_feats, H, W), jnp.float32)   # NCHW input
    params = init_params(kp, n_feats)

    fwd = jax.jit(functools.partial(joint_attention_forward, n_feats=n_feats))
    y = fwd(x, params)
    jax.block_until_ready(y)
    assert y.shape == x.shape and bool(jnp.all(jnp.isfinite(y)))
    print("KERNEL_OK")
</pallas_src>

<mosaic_0001>
module attributes {stable_mosaic.version = 11 : i64} {
  func.func @_mask_taps_kernel(%arg0: i32, %arg1: memref<32x288xbf16, #tpu.memory_space<vmem>>, %arg2: memref<288x16xbf16, #tpu.memory_space<vmem>>, %arg3: memref<1x16xf32, #tpu.memory_space<vmem>>, %arg4: memref<16x288xbf16, #tpu.memory_space<vmem>>, %arg5: memref<1x1xf32, #tpu.memory_space<vmem>>, %arg6: memref<32x288xbf16, #tpu.memory_space<vmem>>) attributes {dimension_semantics = [#tpu.dimension_semantics<parallel>], iteration_bounds = array<i64: 1>, scalar_prefetch = 0 : i64, scratch_operands = 0 : i64, tpu.core_type = #tpu.core_type<tc>, window_params = [{transform_indices = @transform_0, window_bounds = array<i64: 32, 288>}, {pipeline_mode = #tpu.pipeline_mode<synchronous>, transform_indices = @transform_1, window_bounds = array<i64: 288, 16>}, {pipeline_mode = #tpu.pipeline_mode<synchronous>, transform_indices = @transform_2, window_bounds = array<i64: 1, 16>}, {pipeline_mode = #tpu.pipeline_mode<synchronous>, transform_indices = @transform_3, window_bounds = array<i64: 16, 288>}, {pipeline_mode = #tpu.pipeline_mode<synchronous>, transform_indices = @transform_4, window_bounds = array<i64: 1, 1>}, {transform_indices = @transform_5, window_bounds = array<i64: 32, 288>}]} {
    %c0 = arith.constant 0 : index
    %c0_0 = arith.constant 0 : index
    %0 = vector.load %arg1[%c0, %c0_0] : memref<32x288xbf16, #tpu.memory_space<vmem>>, vector<32x288xbf16>
    %c0_1 = arith.constant 0 : index
    %c0_2 = arith.constant 0 : index
    %1 = vector.load %arg2[%c0_1, %c0_2] : memref<288x16xbf16, #tpu.memory_space<vmem>>, vector<288x16xbf16>
    %cst = arith.constant dense<0.000000e+00> : vector<32x16xf32>
    %2 = tpu.matmul %0, %1, %cst {dimension_numbers = #tpu.dot_dimension_numbers<[1], [0], [0], [1], [0, 0, 1, 1], [], []>} : vector<32x288xbf16>, vector<288x16xbf16>, vector<32x16xf32> -> vector<32x16xf32>
    %c0_3 = arith.constant 0 : index
    %c0_4 = arith.constant 0 : index
    %3 = vector.load %arg3[%c0_3, %c0_4] : memref<1x16xf32, #tpu.memory_space<vmem>>, vector<1x16xf32>
    %4 = vector.broadcast %3 : vector<1x16xf32> to vector<32x16xf32>
    %5 = arith.addf %2, %4 : vector<32x16xf32>
    %c0_5 = arith.constant 0 : index
    %c0_6 = arith.constant 0 : index
    %6 = vector.load %arg5[%c0_5, %c0_6] : memref<1x1xf32, #tpu.memory_space<vmem>>, vector<1x1xf32>
    %cst_7 = arith.constant 0.000000e+00 : f32
    %7 = vector.broadcast %cst_7 : f32 to vector<32x16xf32>
    %8 = arith.cmpf oge, %5, %7 : vector<32x16xf32>
    %9 = vector.broadcast %6 : vector<1x1xf32> to vector<32x16xf32>
    %10 = arith.mulf %5, %9 : vector<32x16xf32>
    %11 = arith.select %8, %5, %10 : vector<32x16xi1>, vector<32x16xf32>
    %12 = arith.truncf %11 : vector<32x16xf32> to vector<32x16xbf16>
    %c0_8 = arith.constant 0 : index
    %c0_9 = arith.constant 0 : index
    %13 = vector.load %arg4[%c0_8, %c0_9] : memref<16x288xbf16, #tpu.memory_space<vmem>>, vector<16x288xbf16>
    %cst_10 = arith.constant dense<0.000000e+00> : vector<32x288xf32>
    %14 = tpu.matmul %12, %13, %cst_10 {dimension_numbers = #tpu.dot_dimension_numbers<[1], [0], [0], [1], [0, 0, 1, 1], [], []>} : vector<32x16xbf16>, vector<16x288xbf16>, vector<32x288xf32> -> vector<32x288xf32>
    %15 = arith.truncf %14 : vector<32x288xf32> to vector<32x288xbf16>
    %c0_11 = arith.constant 0 : index
    %c0_12 = arith.constant 0 : index
    %16 = vector.load %arg6[%c0_11, %c0_12] : memref<32x288xbf16, #tpu.memory_space<vmem>>, vector<32x288xbf16>
    tpu.vector_store %arg6[%c0_11, %c0_12], %15 {strides = array<i32>} : memref<32x288xbf16, #tpu.memory_space<vmem>>, vector<32x288xbf16>,
    return
  }
  func.func @transform_0(%arg0: i32) -> (i32, i32) {
    %c0_i32 = arith.constant 0 : i32
    %c0_i32_0 = arith.constant 0 : i32
    return %arg0, %c0_i32 : i32, i32
  }
  func.func @transform_1(%arg0: i32) -> (i32, i32) {
    %c0_i32 = arith.constant 0 : i32
    %c0_i32_0 = arith.constant 0 : i32
    %c0_i32_1 = arith.constant 0 : i32
    return %c0_i32, %c0_i32_0 : i32, i32
  }
  func.func @transform_2(%arg0: i32) -> (i32, i32) {
    %c0_i32 = arith.constant 0 : i32
    %c0_i32_0 = arith.constant 0 : i32
    %c0_i32_1 = arith.constant 0 : i32
    return %c0_i32, %c0_i32_0 : i32, i32
  }
  func.func @transform_3(%arg0: i32) -> (i32, i32) {
    %c0_i32 = arith.constant 0 : i32
    %c0_i32_0 = arith.constant 0 : i32
    %c0_i32_1 = arith.constant 0 : i32
    return %c0_i32, %c0_i32_0 : i32, i32
  }
  func.func @transform_4(%arg0: i32) -> (i32, i32) {
    %c0_i32 = arith.constant 0 : i32
    %c0_i32_0 = arith.constant 0 : i32
    %c0_i32_1 = arith.constant 0 : i32
    return %c0_i32, %c0_i32_0 : i32, i32
  }
  func.func @transform_5(%arg0: i32) -> (i32, i32) {
    %c0_i32 = arith.constant 0 : i32
    %c0_i32_0 = arith.constant 0 : i32
    return %arg0, %c0_i32 : i32, i32
  }
}

module attributes {stable_mosaic.version = 11 : i64} {
  func.func @_mask_apply_body_kernel(%arg0: i32, %arg1: i32, %arg2: memref<1x1x10x18x32xbf16, #tpu.memory_space<vmem>>, %arg3: memref<1x1x10x18x32xbf16, #tpu.memory_space<vmem>>, %arg4: memref<1x1x32x128xf32, #tpu.memory_space<vmem>>, %arg5: memref<1x32xf32, #tpu.memory_space<vmem>>, %arg6: memref<32x288xbf16, #tpu.memory_space<vmem>>, %arg7: memref<32x1xf32, #tpu.memory_space<vmem>>, %arg8: memref<1x1xf32, #tpu.memory_space<vmem>>, %arg9: memref<1x1x32x128xf32, #tpu.memory_space<vmem>>, %arg10: memref<128x288xbf16, #tpu.memory_space<vmem>>) attributes {dimension_semantics = [#tpu.dimension_semantics<parallel>, #tpu.dimension_semantics<parallel>], iteration_bounds = array<i64: 2, 2>, scalar_prefetch = 0 : i64, scratch_operands = 1 : i64, tpu.core_type = #tpu.core_type<tc>, window_params = [{transform_indices = @transform_0, window_bounds = array<i64: 1, 1, 10, 18, 32>}, {transform_indices = @transform_1, window_bounds = array<i64: 1, 1, 10, 18, 32>}, {transform_indices = @transform_2, window_bounds = array<i64: 1, 1, 32, 128>}, {pipeline_mode = #tpu.pipeline_mode<synchronous>, transform_indices = @transform_3, window_bounds = array<i64: 1, 32>}, {pipeline_mode = #tpu.pipeline_mode<synchronous>, transform_indices = @transform_4, window_bounds = array<i64: 32, 288>}, {pipeline_mode = #tpu.pipeline_mode<synchronous>, transform_indices = @transform_5, window_bounds = array<i64: 32, 1>}, {pipeline_mode = #tpu.pipeline_mode<synchronous>, transform_indices = @transform_6, window_bounds = array<i64: 1, 1>}, {transform_indices = @transform_7, window_bounds = array<i64: 1, 1, 32, 128>}]} {
    %c0 = arith.constant 0 : index
    %c0_0 = arith.constant 0 : index
    %c0_1 = arith.constant 0 : index
    %c0_2 = arith.constant 0 : index
    %c0_3 = arith.constant 0 : index
    %0 = vector.load %arg2[%c0, %c0_0, %c0_1, %c0_2, %c0_3] : memref<1x1x10x18x32xbf16, #tpu.memory_space<vmem>>, vector<1x1x10x18x32xbf16>
    %1 = vector.shape_cast %0 : vector<1x1x10x18x32xbf16> to vector<10x18x32xbf16>
    %2 = arith.extf %1 : vector<10x18x32xbf16> to vector<10x18x32xf32>
    %c0_4 = arith.constant 0 : index
    %c0_5 = arith.constant 0 : index
    %3 = vector.load %arg5[%c0_4, %c0_5] : memref<1x32xf32, #tpu.memory_space<vmem>>, vector<1x32xf32>
    %4 = vector.shape_cast %3 : vector<1x32xf32> to vector<1x1x32xf32>
    %5 = vector.broadcast %4 : vector<1x1x32xf32> to vector<10x18x32xf32>
    %6 = arith.addf %2, %5 : vector<10x18x32xf32>
    %cst = arith.constant dense<0xFF800000> : vector<10x18xf32>
    %7 = vector.multi_reduction <maximumf>, %6, %cst [2] : vector<10x18x32xf32> to vector<10x18xf32>
    %8 = vector.shape_cast %7 : vector<10x18xf32> to vector<10x18x1xf32>
    %9 = vector.broadcast %8 : vector<10x18x1xf32> to vector<10x18x32xf32>
    %10 = arith.subf %6, %9 : vector<10x18x32xf32>
    %11 = math.exp %10 : vector<10x18x32xf32>
    %cst_6 = arith.constant dense<0.000000e+00> : vector<10x18xf32>
    %12 = vector.multi_reduction <add>, %11, %cst_6 [2] : vector<10x18x32xf32> to vector<10x18xf32>
    %13 = vector.shape_cast %12 : vector<10x18xf32> to vector<10x18x1xf32>
    %14 = tpu.reciprocal %13 {approx = true} : vector<10x18x1xf32> -> vector<10x18x1xf32>
    %15 = vector.broadcast %14 : vector<10x18x1xf32> to vector<10x18x32xf32>
    %16 = arith.mulf %11, %15 : vector<10x18x32xf32>
    %c0_7 = arith.constant 0 : index
    %c0_8 = arith.constant 0 : index
    %c0_9 = arith.constant 0 : index
    %c0_10 = arith.constant 0 : index
    %c0_11 = arith.constant 0 : index
    %17 = vector.load %arg3[%c0_7, %c0_8, %c0_9, %c0_10, %c0_11] : memref<1x1x10x18x32xbf16, #tpu.memory_space<vmem>>, vector<1x1x10x18x32xbf16>
    %18 = vector.shape_cast %17 : vector<1x1x10x18x32xbf16> to vector<10x18x32xbf16>
    %19 = arith.extf %18 : vector<10x18x32xbf16> to vector<10x18x32xf32>
    %20 = arith.mulf %16, %19 : vector<10x18x32xf32>
    %21 = arith.truncf %20 : vector<10x18x32xf32> to vector<10x18x32xbf16>
    %22 = vector.extract_strided_slice %21 {offsets = [0, 0, 0], sizes = [8, 16, 32], strides = [1, 1, 1]} : vector<10x18x32xbf16> to vector<8x16x32xbf16>
    %23 = vector.shape_cast %22 : vector<8x16x32xbf16> to vector<128x32xbf16>
    %c0_12 = arith.constant 0 : index
    %c0_13 = arith.constant 0 : index
    %24 = vector.load %arg10[%c0_12, %c0_13] : memref<128x288xbf16, #tpu.memory_space<vmem>>, vector<128x32xbf16>
    tpu.vector_store %arg10[%c0_12, %c0_13], %23 {strides = array<i32>} : memref<128x288xbf16, #tpu.memory_space<vmem>>, vector<128x32xbf16>,
    %25 = vector.extract_strided_slice %21 {offsets = [0, 1, 0], sizes = [8, 16, 32], strides = [1, 1, 1]} : vector<10x18x32xbf16> to vector<8x16x32xbf16>
    %26 = vector.shape_cast %25 : vector<8x16x32xbf16> to vector<128x32xbf16>
    %c0_14 = arith.constant 0 : index
    %c32 = arith.constant 32 : index
    %27 = vector.load %arg10[%c0_14, %c32] : memref<128x288xbf16, #tpu.memory_space<vmem>>, vector<128x32xbf16>
    tpu.vector_store %arg10[%c0_14, %c32], %26 {strides = array<i32>} : memref<128x288xbf16, #tpu.memory_space<vmem>>, vector<128x32xbf16>,
    %28 = vector.extract_strided_slice %21 {offsets = [0, 2, 0], sizes = [8, 16, 32], strides = [1, 1, 1]} : vector<10x18x32xbf16> to vector<8x16x32xbf16>
    %29 = vector.shape_cast %28 : vector<8x16x32xbf16> to vector<128x32xbf16>
    %c0_15 = arith.constant 0 : index
    %c64 = arith.constant 64 : index
    %30 = vector.load %arg10[%c0_15, %c64] : memref<128x288xbf16, #tpu.memory_space<vmem>>, vector<128x32xbf16>
    tpu.vector_store %arg10[%c0_15, %c64], %29 {strides = array<i32>} : memref<128x288xbf16, #tpu.memory_space<vmem>>, vector<128x32xbf16>,
    %31 = vector.extract_strided_slice %21 {offsets = [1, 0, 0], sizes = [8, 16, 32], strides = [1, 1, 1]} : vector<10x18x32xbf16> to vector<8x16x32xbf16>
    %32 = vector.shape_cast %31 : vector<8x16x32xbf16> to vector<128x32xbf16>
    %c0_16 = arith.constant 0 : index
    %c96 = arith.constant 96 : index
    %33 = vector.load %arg10[%c0_16, %c96] : memref<128x288xbf16, #tpu.memory_space<vmem>>, vector<128x32xbf16>
    tpu.vector_store %arg10[%c0_16, %c96], %32 {strides = array<i32>} : memref<128x288xbf16, #tpu.memory_space<vmem>>, vector<128x32xbf16>,
    %34 = vector.extract_strided_slice %21 {offsets = [1, 1, 0], sizes = [8, 16, 32], strides = [1, 1, 1]} : vector<10x18x32xbf16> to vector<8x16x32xbf16>
    %35 = vector.shape_cast %34 : vector<8x16x32xbf16> to vector<128x32xbf16>
    %c0_17 = arith.constant 0 : index
    %c128 = arith.constant 128 : index
    %36 = vector.load %arg10[%c0_17, %c128] : memref<128x288xbf16, #tpu.memory_space<vmem>>, vector<128x32xbf16>
    tpu.vector_store %arg10[%c0_17, %c128], %35 {strides = array<i32>} : memref<128x288xbf16, #tpu.memory_space<vmem>>, vector<128x32xbf16>,
    %37 = vector.extract_strided_slice %21 {offsets = [1, 2, 0], sizes = [8, 16, 32], strides = [1, 1, 1]} : vector<10x18x32xbf16> to vector<8x16x32xbf16>
    %38 = vector.shape_cast %37 : vector<8x16x32xbf16> to vector<128x32xbf16>
    %c0_18 = arith.constant 0 : index
    %c160 = arith.constant 160 : index
    %39 = vector.load %arg10[%c0_18, %c160] : memref<128x288xbf16, #tpu.memory_space<vmem>>, vector<128x32xbf16>
    tpu.vector_store %arg10[%c0_18, %c160], %38 {strides = array<i32>} : memref<128x288xbf16, #tpu.memory_space<vmem>>, vector<128x32xbf16>,
    %40 = vector.extract_strided_slice %21 {offsets = [2, 0, 0], sizes = [8, 16, 32], strides = [1, 1, 1]} : vector<10x18x32xbf16> to vector<8x16x32xbf16>
    %41 = vector.shape_cast %40 : vector<8x16x32xbf16> to vector<128x32xbf16>
    %c0_19 = arith.constant 0 : index
    %c192 = arith.constant 192 : index
    %42 = vector.load %arg10[%c0_19, %c192] : memref<128x288xbf16, #tpu.memory_space<vmem>>, vector<128x32xbf16>
    tpu.vector_store %arg10[%c0_19, %c192], %41 {strides = array<i32>} : memref<128x288xbf16, #tpu.memory_space<vmem>>, vector<128x32xbf16>,
    %43 = vector.extract_strided_slice %21 {offsets = [2, 1, 0], sizes = [8, 16, 32], strides = [1, 1, 1]} : vector<10x18x32xbf16> to vector<8x16x32xbf16>
    %44 = vector.shape_cast %43 : vector<8x16x32xbf16> to vector<128x32xbf16>
    %c0_20 = arith.constant 0 : index
    %c224 = arith.constant 224 : index
    %45 = vector.load %arg10[%c0_20, %c224] : memref<128x288xbf16, #tpu.memory_space<vmem>>, vector<128x32xbf16>
    tpu.vector_store %arg10[%c0_20, %c224], %44 {strides = array<i32>} : memref<128x288xbf16, #tpu.memory_space<vmem>>, vector<128x32xbf16>,
    %46 = vector.extract_strided_slice %21 {offsets = [2, 2, 0], sizes = [8, 16, 32], strides = [1, 1, 1]} : vector<10x18x32xbf16> to vector<8x16x32xbf16>
    %47 = vector.shape_cast %46 : vector<8x16x32xbf16> to vector<128x32xbf16>
    %c0_21 = arith.constant 0 : index
    %c256 = arith.constant 256 : index
    %48 = vector.load %arg10[%c0_21, %c256] : memref<128x288xbf16, #tpu.memory_space<vmem>>, vector<128x32xbf16>
    tpu.vector_store %arg10[%c0_21, %c256], %47 {strides = array<i32>} : memref<128x288xbf16, #tpu.memory_space<vmem>>, vector<128x32xbf16>,
    %c0_22 = arith.constant 0 : index
    %c0_23 = arith.constant 0 : index
    %49 = vector.load %arg6[%c0_22, %c0_23] : memref<32x288xbf16, #tpu.memory_space<vmem>>, vector<32x288xbf16>
    %c0_24 = arith.constant 0 : index
    %c0_25 = arith.constant 0 : index
    %50 = vector.load %arg10[%c0_24, %c0_25] : memref<128x288xbf16, #tpu.memory_space<vmem>>, vector<128x288xbf16>
    %cst_26 = arith.constant dense<0.000000e+00> : vector<32x128xf32>
    %51 = tpu.matmul %49, %50, %cst_26 {dimension_numbers = #tpu.dot_dimension_numbers<[1], [1], [0], [0], [0, 0, 1, 0], [], []>} : vector<32x288xbf16>, vector<128x288xbf16>, vector<32x128xf32> -> vector<32x128xf32>
    %c0_27 = arith.constant 0 : index
    %c0_28 = arith.constant 0 : index
    %52 = vector.load %arg7[%c0_27, %c0_28] : memref<32x1xf32, #tpu.memory_space<vmem>>, vector<32x1xf32>
    %53 = vector.broadcast %52 : vector<32x1xf32> to vector<32x128xf32>
    %54 = arith.addf %51, %53 : vector<32x128xf32>
    %c0_29 = arith.constant 0 : index
    %c0_30 = arith.constant 0 : index
    %55 = vector.load %arg8[%c0_29, %c0_30] : memref<1x1xf32, #tpu.memory_space<vmem>>, vector<1x1xf32>
    %cst_31 = arith.constant 0.000000e+00 : f32
    %56 = vector.broadcast %cst_31 : f32 to vector<32x128xf32>
    %57 = arith.cmpf oge, %54, %56 : vector<32x128xf32>
    %58 = vector.broadcast %55 : vector<1x1xf32> to vector<32x128xf32>
    %59 = arith.mulf %54, %58 : vector<32x128xf32>
    %60 = arith.select %57, %54, %59 : vector<32x128xi1>, vector<32x128xf32>
    %c0_32 = arith.constant 0 : index
    %c0_33 = arith.constant 0 : index
    %c0_34 = arith.constant 0 : index
    %c0_35 = arith.constant 0 : index
    %61 = vector.load %arg4[%c0_32, %c0_33, %c0_34, %c0_35] : memref<1x1x32x128xf32, #tpu.memory_space<vmem>>, vector<1x1x32x128xf32>
    %62 = vector.shape_cast %61 : vector<1x1x32x128xf32> to vector<32x128xf32>
    %63 = arith.addf %60, %62 : vector<32x128xf32>
    %c0_36 = arith.constant 0 : index
    %c0_37 = arith.constant 0 : index
    %c0_38 = arith.constant 0 : index
    %c0_39 = arith.constant 0 : index
    %64 = vector.load %arg9[%c0_36, %c0_37, %c0_38, %c0_39] : memref<1x1x32x128xf32, #tpu.memory_space<vmem>>, vector<1x1x32x128xf32>
    %65 = vector.shape_cast %64 : vector<1x1x32x128xf32> to vector<32x128xf32>
    %66 = vector.shape_cast %63 : vector<32x128xf32> to vector<1x1x32x128xf32>
    tpu.vector_store %arg9[%c0_36, %c0_37, %c0_38, %c0_39], %66 {strides = array<i32>} : memref<1x1x32x128xf32, #tpu.memory_space<vmem>>, vector<1x1x32x128xf32>,
    return
  }
  func.func @transform_0(%arg0: i32, %arg1: i32) -> (i32, i32, i32, i32, i32) {
    %c0_i32 = arith.constant 0 : i32
    %c0_i32_0 = arith.constant 0 : i32
    %c0_i32_1 = arith.constant 0 : i32
    %c0_i32_2 = arith.constant 0 : i32
    return %arg0, %arg1, %c0_i32, %c0_i32_0, %c0_i32_1 : i32, i32, i32, i32, i32
  }
  func.func @transform_1(%arg0: i32, %arg1: i32) -> (i32, i32, i32, i32, i32) {
    %c0_i32 = arith.constant 0 : i32
    %c0_i32_0 = arith.constant 0 : i32
    %c0_i32_1 = arith.constant 0 : i32
    %c0_i32_2 = arith.constant 0 : i32
    return %arg0, %arg1, %c0_i32, %c0_i32_0, %c0_i32_1 : i32, i32, i32, i32, i32
  }
  func.func @transform_2(%arg0: i32, %arg1: i32) -> (i32, i32, i32, i32) {
    %c0_i32 = arith.constant 0 : i32
    %c0_i32_0 = arith.constant 0 : i32
    %c0_i32_1 = arith.constant 0 : i32
    return %arg0, %arg1, %c0_i32, %c0_i32_0 : i32, i32, i32, i32
  }
  func.func @transform_3(%arg0: i32, %arg1: i32) -> (i32, i32) {
    %c0_i32 = arith.constant 0 : i32
    %c0_i32_0 = arith.constant 0 : i32
    %c0_i32_1 = arith.constant 0 : i32
    return %c0_i32, %c0_i32_0 : i32, i32
  }
  func.func @transform_4(%arg0: i32, %arg1: i32) -> (i32, i32) {
    %c0_i32 = arith.constant 0 : i32
    %c0_i32_0 = arith.constant 0 : i32
    %c0_i32_1 = arith.constant 0 : i32
    return %c0_i32, %c0_i32_0 : i32, i32
  }
  func.func @transform_5(%arg0: i32, %arg1: i32) -> (i32, i32) {
    %c0_i32 = arith.constant 0 : i32
    %c0_i32_0 = arith.constant 0 : i32
    %c0_i32_1 = arith.constant 0 : i32
    return %c0_i32, %c0_i32_0 : i32, i32
  }
  func.func @transform_6(%arg0: i32, %arg1: i32) -> (i32, i32) {
    %c0_i32 = arith.constant 0 : i32
    %c0_i32_0 = arith.constant 0 : i32
    %c0_i32_1 = arith.constant 0 : i32
    return %c0_i32, %c0_i32_0 : i32, i32
  }
  func.func @transform_7(%arg0: i32, %arg1: i32) -> (i32, i32, i32, i32) {
    %c0_i32 = arith.constant 0 : i32
    %c0_i32_0 = arith.constant 0 : i32
    %c0_i32_1 = arith.constant 0 : i32
    return %arg0, %arg1, %c0_i32, %c0_i32_0 : i32, i32, i32, i32
  }
}

</mosaic_0001>

<bundles_post_ra>
// kernel: joint_attention_forward.2
= control target key start
LH: loop header
LB: loop body
LE: loop exit
PB: predicated region body
PF: predicated region fallthrough
CT: control target
= control target key end

     0   :  { %v655_v1 = vmov 0   ;;  %vm212_vm0 = vcmask 261120   ;;  %vm361_vm3 = vcmask 130048   ;;  %vm511_vm6 = vcmask 257024   ;;  %s806_s1 = inlined_call_operand.vmem [shape: bf16[288,16], index: 1, kind: input, shape index: {}]   ;;  %s807_s4 = inlined_call_operand.<no memory space> [shape: f32[1,1], index: 4, kind: input, shape index: {}]   ;;  %s808_s0 = inlined_call_operand.vmem [shape: bf16[32,288], index: 0, kind: input, shape index: {}]   ;;  %s809_s3 = inlined_call_operand.vmem [shape: bf16[16,288], index: 3, kind: input, shape index: {}]   ;;  %s810_s2 = inlined_call_operand.vmem [shape: f32[1,16], index: 2, kind: input, shape index: {}]   ;;  %s811_s5 = inlined_call_operand.vmem [shape: bf16[32,288], index: 5, kind: output, shape index: {}]  }
   0x1   :  { %v625_v0 = vld [vmem:[%s806_s1 + $0x40] sm:$0xff]   ;;  %624 = vset.pattern.permute.xlu0 %v655_v1  ;;  %v10_v2 = vstv %s807_s4  ;;  %v627_v4 = vld [vmem:[%s806_s1 + $0x48] sm:$0xff]   ;;  %v629_v6 = vld [vmem:[%s806_s1 + $0x50] sm:$0xff]  }
   0x2   :  { %v626_v3 = vld [vmem:[%s806_s1] sm:$0xff]   ;;  %11 = vst [vmem:[#allocation2] sm:$0x1] %v10_v2  ;;  %574 = vmatprep.subr.bf16.mxu0 %v625_v0  ;;  %v628_v5 = vld [vmem:[%s806_s1 + $0x8] sm:$0xff]   ;;  %v630_v7 = vld [vmem:[%s806_s1 + $0x10] sm:$0xff]  }
   0x3   :  { %575 = vmatpush3.bf16.msra.mxu0 %v626_v3  ;;  %v631_v8 = vld [vmem:[%s806_s1 + $0x58] sm:$0xff]   ;;  %v633_v10 = vld [vmem:[%s806_s1 + $0x60] sm:$0xff]   ;;  %v635_v13 = vld [vmem:[%s806_s1 + $0x68] sm:$0xff]  }
   0x4   :  { %576 = vmatprep.subr.bf16.mxu0 %v627_v4  ;;  %v632_v9 = vld [vmem:[%s806_s1 + $0x18] sm:$0xff]   ;;  %v639_v11 = vld [vmem:[%s806_s1 + $0x80] sm:$0xff]   ;;  %v636_v14 = vld [vmem:[%s806_s1 + $0x28] sm:$0xff]  }
   0x5   :  { %v634_v12 = vld [vmem:[%s806_s1 + $0x20] sm:$0xff]   ;;  %609 = vmatprep.subr.bf16.mxu1 %v639_v11  ;;  %v642_v15 = vld [vmem:[%s806_s1 + $0x88] sm:$0xff]   ;;  %v637_v16 = vld [vmem:[%s806_s1 + $0x70] sm:$0xff]  }
   0x6   :  { %610 = vmatpush3.bf16.msra.mxu1 %v639_v11  ;;  %v645_v17 = vld [vmem:[%s808_s0 + $0x4] ss:$12 sps:$4 sm:$0xff]   ;;  %v646_v18 = vld [vmem:[%s808_s0 + $0x8] ss:$12 sps:$4 sm:$0xff]   ;;  %v647_v19 = vld [vmem:[%s808_s0 + $0x20] ss:$12 sps:$4 sm:$0xff]  }
   0x7   :  { %577 = vmatpush3.bf16.msra.mxu0 %v628_v5  ;;  %611 = vmatprep.subr.bf16.mxu1 %v642_v15  ;;  %v638_v21 = vld [vmem:[%s806_s1 + $0x30] sm:$0xff]   ;;  %v640_v22 = vld [vmem:[%s806_s1 + $0x78] sm:$0xff]   ;;  %v643_v24 = vld [vmem:[%s808_s0] ss:$12 sps:$4 sm:$0xff]  }
   0x8   :  { %578 = vmatprep.subr.bf16.mxu0 %v629_v6  ;;  %251 = vmatprep.mubr.bf16.mxu0 %v645_v17  ;;  %v641_v23 = vld [vmem:[%s806_s1 + $0x38] sm:$0xff]   ;;  %v653_v27 = vld [vmem:[%s809_s3 + $0x4] ss:$12 sps:$4 sm:$0xff]   ;;  %v651_v28 = vld [vmem:[%s809_s3] ss:$12 sps:$4 sm:$0xff]  }
   0x9   :  { %613 = vmatprep.mubr.msk.bf16.mxu1 %vm212_vm0, %v646_v18  ;;  %v550_v20 = vld [vmem:[#allocation2] ss:$0 sm:$0xff]  ;;  %v648_v25 = vld [vmem:[%s808_s0 + $0x1c] ss:$12 sps:$4 sm:$0xff]   ;;  %v650_v26 = vld [vmem:[%s808_s0 + $0x18] ss:$12 sps:$4 sm:$0xff]  }
   0xa   :  { %612 = vmatpush3.bf16.msra.mxu1 %v642_v15  ;;  %328 = vperm.xlu0 %624, %v550_v20   ;;  %v654_v29 = vld [vmem:[%s809_s3 + $0x8] ss:$12 sps:$4 sm:$0xff]   ;;  %v523_v36 = vld [vmem:[%s810_s2] ss:$0 sm:$0xff] }
   0xb   :  { %579 = vmatpush3.bf16.msra.mxu0 %v630_v7  ;;  %368 = vmatprep.subr.bf16.mxu1 %v653_v27 }
   0xc   :  { %580 = vmatprep.subr.bf16.mxu0 %v631_v8 }
   0xd   :  { %614 = vmatmul.mubr.msk.bf16.vlgmr.msra.gmra.mrb[0].mxu1 %vm212_vm0, %v647_v19 }
   0xe   :  { %400 = vmatprep.mubr.bf16.mxu1 %v655_v1  ;;  %369 = vmatpush1.bf16.msra.mxu1 %v651_v28 }
   0xf   :  { %581 = vmatpush3.bf16.msra.mxu0 %v632_v9  ;;  %617 = vmatprep.subr.bf16.mxu1 %v654_v29 }
  0x10   :  { %582 = vmatprep.subr.bf16.mxu0 %v633_v10 }
  0x13   :  { %583 = vmatpush3.bf16.msra.mxu0 %v634_v12 }
  0x14   :  { %584 = vmatprep.subr.bf16.mxu0 %v635_v13 }
  0x17   :  { %585 = vmatpush3.bf16.msra.mxu0 %v636_v14 }
  0x18   :  { %586 = vmatprep.subr.bf16.mxu0 %v637_v16 }
  0x1b   :  { %587 = vmatpush3.bf16.msra.mxu0 %v638_v21 }
  0x1c   :  { %588 = vmatprep.subr.bf16.mxu0 %v640_v22 }
  0x1f   :  { %589 = vmatpush3.bf16.msra.mxu0 %v641_v23 }
  0x22   :  { %252 = vmatmul.mubr.bf16.vlgmr.msra.gmra.mrb[0].mxu0 %v643_v24 }
  0x23   :  { %259 = vmatprep.mubr.bf16.mxu0 %v648_v25 }
  0x2a   :  { %260 = vmatmul.mubr.bf16.gmra.mrb[4].mxu0 %v650_v26 }
  0x89   :  { %v329_v42 = vpop.permute.xlu0 %328 }
  0xe0   :  { %v615_v30 = vpop.f32.mrb[0].mxu1 }
  0xe1   :  { %v302_v31 = vpop.f32.mrb[1].mxu1 }
  0xe2   :  { %v616_v32 = vpop.f32.mrb[2].mxu1 }
  0xe3   :  { %v305_v33 = vpop.f32.mrb[3].mxu1 }
  0xf5   :  { %v590_v34 = vpop.f32.mrb[0].mxu0 }
  0xf6   :  { %v591_v35 = vpop.f32.mrb[1].mxu0 }
  0xf7   :  { %v592_v37 = vadd.f32 %v591_v35, %v590_v34  ;;  %v593_v38 = vpop.f32.mrb[2].mxu0 }
  0xf8   :  { %v594_v39 = vpop.f32.mrb[3].mxu0 }
  0xf9   :  { %v254_v40 = vadd.f32 %v592_v37, %v523_v36  ;;  %v595_v41 = vadd.f32 %v594_v39, %v593_v38 }
  0xfb   :  { %v303_v43 = vadd.f32 %v302_v31, %v254_v40  ;;  %v257_v44 = vadd.f32 %v595_v41, %v523_v36 }
  0xfd   :  { %v306_v45 = vadd.f32 %v305_v33, %v257_v44  ;;  %v331_v46 = vmul.f32 %v329_v42, %v303_v43  ;;  %v596_v47 = vpop.f32.mrb[4].mxu0  ;;  %vm318_vm1 = vcmp.ge.f32.partialorder %v303_v43, 0.0 }
  0xfe   :  { %v597_v48 = vpop.f32.mrb[5].mxu0 }
  0xff   :  { %vm319_vm2 = vcmp.ge.f32.partialorder %v306_v45, 0.0  ;;  %v332_v49 = vmul.f32 %v329_v42, %v306_v45  ;;  %v598_v50 = vadd.f32 %v597_v48, %v596_v47  ;;  %v599_v51 = vpop.f32.mrb[6].mxu0  ;;  %v335_v53 = vsel %vm318_vm1, %v303_v43, %v331_v46 }
 0x100   :  { %v600_v52 = vpop.f32.mrb[7].mxu0 }
 0x101   :  { %v336_v54 = vsel %vm319_vm2, %v306_v45, %v332_v49  ;;  %v262_v55 = vadd.f32 %v598_v50, %v523_v36  ;;  %v601_v56 = vadd.f32 %v600_v52, %v599_v51 }
 0x102   :  { %v339_v57 = vpack.c.bf16 %v336_v54, %v335_v53 }
 0x103   :  { %v311_v58 = vadd.f32 %v615_v30, %v262_v55  ;;  %v265_v59 = vadd.f32 %v601_v56, %v523_v36 }
 0x104   :  { %554 = vmatmul.mubr.msk.bf16.vlgmr.msra.gmra.mrb[4].mxu1 %vm361_vm3, %v339_v57 }
 0x105   :  { %v333_v60 = vmul.f32 %v329_v42, %v311_v58  ;;  %v314_v61 = vadd.f32 %v616_v32, %v265_v59  ;;  %618 = vmatpush3.bf16.msra.mxu1 %v654_v29  ;;  %410 = vmatprep.mubr.bf16.mxu1 %v655_v1  ;;  %vm320_vm4 = vcmp.ge.f32.partialorder %v311_v58, 0.0 }
 0x107   :  { %vm321_vm5 = vcmp.ge.f32.partialorder %v314_v61, 0.0  ;;  %v334_v62 = vmul.f32 %v329_v42, %v314_v61  ;;  %v337_v63 = vsel %vm320_vm4, %v311_v58, %v333_v60 }
 0x109   :  { %v338_v0 = vsel %vm321_vm5, %v314_v61, %v334_v62 }
 0x10a   :  { %v340_v2 = vpack.c.bf16 %v338_v0, %v337_v63 }
 0x10c   :  { %555 = vmatmul.mubr.msk.bf16.gmra.mrb[8].mxu1 %vm361_vm3, %v340_v2 }
 0x10d   :  { %619 = vmatprep.mubr.msk.bf16.mxu1 %vm361_vm3, %v339_v57 }
 0x114   :  { %620 = vmatmul.mubr.msk.bf16.vlgmr.msra.gmra.mrb[12].mxu1 %vm361_vm3, %v340_v2 }
 0x1d7   :  { %v402_v3 = vpop.f32.mrb[4].mxu1 }
 0x1d8   :  { %v404_v4 = vpop.f32.mrb[5].mxu1 }
 0x1d9   :  { %v566_v5 = vpack.c.bf16 %v404_v4, %v402_v3  ;;  %v406_v6 = vpop.f32.mrb[6].mxu1 }
 0x1da   :  { %v408_v7 = vpop.f32.mrb[7].mxu1 }
 0x1db   :  { %510 = vst [vmem:[%s811_s5] sm:$0xff] %v566_v5  ;;  %v568_v1 = vpack.c.bf16 %v408_v7, %v406_v6 }
 0x1dd   :  { %513 = vst [vmem:[%s811_s5 + $0xc] sm:$0xff] %v568_v1 }
 0x1df   :  { %v412_v8 = vpop.f32.mrb[8].mxu1 }
 0x1e0   :  { %v414_v9 = vpop.f32.mrb[9].mxu1 }
 0x1e1   :  { %v570_v10 = vpack.c.bf16 %v414_v9, %v412_v8  ;;  %v416_v11 = vpop.f32.mrb[10].mxu1 }
 0x1e2   :  { %v418_v12 = vpop.f32.mrb[11].mxu1 }
 0x1e3   :  { %515 = vst [vmem:[%s811_s5 + $0x18] sm:$0xff] %v570_v10  ;;  %v572_v13 = vpack.c.bf16 %v418_v12, %v416_v11 }
 0x1e5   :  { %517 = vst [vmem:[%s811_s5 + $0x24] sm:$0xff] %v572_v13 }
 0x1e7   :  { %v621_v14 = vpop.f32.mrb[12].mxu1 }
 0x1e8   :  { %v571_v15 = vpack.c.bf16 %v621_v14, %v621_v14  ;;  %v455_v16 = vpop.f32.mrb[13].mxu1 }
 0x1e9   :  { %v567_v17 = vpack.c.bf16 %v455_v16, %v455_v16  ;;  %v622_v18 = vpop.f32.mrb[14].mxu1 }
 0x1ea   :  { %516 = vst.msk [vmem:[%s811_s5 + $0x20] sm:$0xf] %vm511_vm6, %v571_v15  ;;  %v573_v19 = vpack.c.bf16 %v622_v18, %v622_v18  ;;  %v458_v20 = vpop.f32.mrb[15].mxu1 }
 0x1eb   :  { %512 = vst.msk [vmem:[%s811_s5 + $0x8] sm:$0xf] %vm511_vm6, %v567_v17  ;;  %v569_v21 = vpack.c.bf16 %v458_v20, %v458_v20 }
 0x1ec   :  { %518 = vst.msk [vmem:[%s811_s5 + $0x2c] sm:$0xf] %vm511_vm6, %v573_v19 }
 0x1ed   :  { %514 = vst.msk [vmem:[%s811_s5 + $0x14] sm:$0xf] %vm511_vm6, %v569_v21 }

// kernel: joint_attention_forward.3
= control target key start
LH: loop header
LB: loop body
LE: loop exit
PB: predicated region body
PF: predicated region fallthrough
CT: control target
= control target key end

     0   :  { %s2091_s26 = smov 0   ;;  %s2093_s27 = smov 0   ;;  %s2955_s0 = inlined_call_operand.vmem [shape: bf16[2,2,10,18,32], index: 0, kind: input, shape index: {}]   ;;  %s2956_s1 = inlined_call_operand.vmem [shape: bf16[2,2,10,18,32], index: 1, kind: input, shape index: {}]   ;;  %s2957_s2 = inlined_call_operand.vmem [shape: f32[2,2,32,128], index: 2, kind: input, shape index: {}]   ;;  %s2958_s3 = inlined_call_operand.vmem [shape: f32[1,32], index: 3, kind: input, shape index: {}]   ;;  %s2959_s4 = inlined_call_operand.vmem [shape: bf16[32,288], index: 4, kind: input, shape index: {}]   ;;  %s2960_s5 = inlined_call_operand.vmem [shape: f32[32,1], index: 5, kind: input, shape index: {}]   ;;  %s2961_s6 = inlined_call_operand.<no memory space> [shape: f32[1,1], index: 6, kind: input, shape index: {}]   ;;  %s2962_s7 = inlined_call_operand.vmem [shape: f32[2,2,32,128], index: 7, kind: output, shape index: {}]  }
   0x1   :  { %v12_v0 = vstv %s2961_s6  ;;  %s2095_s28 = smov 0   ;;  %s2097_s29 = smov 0  }
   0x2   :  { %13 = vst [vmem:[#allocation3] sm:$0x1] %v12_v0  ;;  %s2099_s30 = smov 0  }
   0x3 LB: > { %s28_s6 = sadd.s32 1, %s2034_s28  ;;  %s31_s8 = sadd.s32 1, %s2038_s29  ;;  %s2042_s30 = sphi %s2099_s30, %s19_s30   ;;  %s2038_s29 = sphi %s2097_s29, %s2978_s29   ;;  %s2034_s28 = sphi %s2095_s28, %s2977_s28   ;;  %s2030_s27 = sphi %s2093_s27, %s2976_s27   ;;  %s2026_s26 = sphi %s2091_s26, %s2975_s26  }
   0x4   : > { %p29_p0 = scmp.ge.s32.totalorder %s28_s6, 2  ;;  %p1721_p1 = scmp.ge.s32.totalorder %s2042_s30, 1 }
   0x5   : > { %p291_p2 = scmp.lt.s32.totalorder %s2042_s30, 5 }
   0x6   : > { %s2980_s6 = smov (%p29_p0, %s28_s6), 0  ;;  %s2982_s8 = smov (!%p29_p0, %s31_s8), %s2038_s29 }
   0x7   : > { %p292_p3 = pnand %p1721_p1, %p291_p2  ;;  %p33_p4 = scmp.ge.s32.totalorder %s2982_s8, 2 }
   0x8   : > { %p349_p5 = scmp.lt.s32.totalorder (!%p292_p3), %s2030_s27, 1  ;;  %p351_p6 = scmp.lt.s32.totalorder (!%p292_p3), %s2026_s26, 1  ;;  %v2140_v1 = vld [vmem:[%s2958_s3] ss:$0 sm:$0xff] (!%p292_p3)  ;;  %vm483_vm0 = vcmask (!%p292_p3), 261120   ;;  %vm490_vm1 = vcmask (!%p292_p3), 254976  }
   0x9   : > { %s2984_s8 = smov (%p33_p4, %s2982_s8), 0  ;;  %295 = sbr.rel (%p292_p3) target bundleno = 824 (0x338), region = 48 }
   0xa   : > { %s2044_s21 = smov (!%p292_p3), 64   ;;  %vm1079_vm2 = vcmask (!%p292_p3), 1046528   ;;  %vm933_vm3 = vsmask.f32 (!%p292_p3), 7424  ;;  %s2045_s22 = smov (!%p292_p3), 96   ;;  %vm1054_vm4 = vcmask (!%p292_p3), 523520  }
   0xb   : > { %s2046_s23 = smov (!%p292_p3), 32   ;;  %vm1128_vm5 = vcmask (!%p292_p3), 785920   ;;  %vm1162_vm6 = vcmask (!%p292_p3), 1048320  }
  0x10   : > { %s2986_s27 = smov (!%p349_p5, %s2030_s27), 1  ;;  %s2988_s26 = smov (!%p351_p6, %s2026_s26), 1 }
  0x11   : > { %s1829_s9 = smul.u32 60, %s2986_s27 }
  0x12   : > { %s1828_s10 = smul.u32 30, %s2988_s26 }
  0x14   : > { %s2127_s11 = sadd.s32 %s1829_s9, %s1828_s10  ;;  %s1724_s10 = sshll.u32 %s2988_s26, 2 }
  0x15   : > { %s1722_s12 = sshll.u32 %s2127_s11, 2  ;;  %s1725_s11 = sshll.u32 %s2986_s27, 3 }
  0x16   : > { %s2135_s15 = scalar_lea.vmem %s2955_s0, %s1722_s12  ;;  %s2467_s20 = scalar_lea.vmem %s2956_s1, %s1722_s12 }
  0x17   : > { %v1743_v2 = vld [vmem:[%s2135_s15] sm:$0xff]   ;;  %v1782_v3 = vld [vmem:[%s2135_s15 + $0x18] sm:$0xff]   ;;  %v388_v4 = vld [vmem:[%s2135_s15 + $0x8] sm:$0x1]  ;;  %s373_s12 = sadd.s32 %s1725_s11, %s1724_s10 }
  0x18   : > { %v1744_v5 = vunpack.c.l.bf16 %v1743_v2  ;;  %v1748_v6 = vunpack.c.l.bf16 %v1782_v3  ;;  %v1745_v7 = vunpack.c.h.bf16 %v1743_v2  ;;  %v1749_v8 = vunpack.c.h.bf16 %v1782_v3  ;;  %v389_v9 = vld [vmem:[%s2135_s15 + $0xc] sm:$0xff]   ;;  %v391_v16 = vld [vmem:[%s2135_s15 + $0x14] sm:$0x1]  ;;  %v394_v25 = vld [vmem:[%s2135_s15 + $0x20] sm:$0x1]  ;;  %s1726_s13 = sshll.u32 %s373_s12, 3 }
  0x19   : > { %v418_v10 = vunpack.c.l.bf16 %v388_v4  ;;  %v419_v11 = vunpack.c.l.bf16 %v389_v9  ;;  %v420_v19 = vunpack.c.h.bf16 %v389_v9  ;;  %v421_v20 = vunpack.c.l.bf16 %v391_v16  ;;  %v395_v26 = vld [vmem:[%s2135_s15 + $0x24] sm:$0xff]   ;;  %v397_v33 = vld [vmem:[%s2135_s15 + $0x2c] sm:$0x1]  ;;  %v1783_v40 = vld [vmem:[%s2135_s15 + $0x30] sm:$0xff]   ;;  %s2931_s16 = scalar_lea.vmem %s2957_s2, %s1726_s13  ;;  %s384_s17 = scalar_lea.vmem %s2962_s7, %s1726_s13 }
  0x1a   : > { %v2147_v12 = vadd.f32 %v1744_v5, %v2140_v1  ;;  %v2150_v13 = vadd.f32 %v1748_v6, %v2140_v1  ;;  %v2153_v14 = vadd.f32 %v1745_v7, %v2140_v1  ;;  %v2156_v15 = vadd.f32 %v1749_v8, %v2140_v1  ;;  %v400_v47 = vld [vmem:[%s2135_s15 + $0x38] sm:$0x1]  ;;  %v401_v48 = vld [vmem:[%s2135_s15 + $0x3c] sm:$0xff]   ;;  %v403_v55 = vld [vmem:[%s2135_s15 + $0x44] sm:$0x1] }
  0x1b   : > { %v2168_v23 = vadd.f32 %v2140_v1, %v418_v10  ;;  %v2171_v24 = vadd.f32 %v2140_v1, %v419_v11  ;;  %v2176_v27 = vadd.f32 %v2140_v1, %v420_v19  ;;  %v2179_v28 = vadd.f32 %v2140_v1, %v421_v20  ;;  %v1784_v62 = vld [vmem:[%s2135_s15 + $0x48] sm:$0xff]   ;;  %v406_v6 = vld [vmem:[%s2135_s15 + $0x50] sm:$0x1]  ;;  %v407_v7 = vld [vmem:[%s2135_s15 + $0x54] sm:$0xff]  }
  0x1c   : > { %v484_v17 = vsel %vm483_vm0, %v2147_v12, -inf  ;;  %v503_v18 = vsel %vm483_vm0, %v2150_v13, -inf  ;;  %v487_v21 = vsel %vm483_vm0, %v2153_v14, -inf  ;;  %v506_v22 = vsel %vm483_vm0, %v2156_v15, -inf }
  0x1d   : > { %485 = vmax.xlane.f32.xlu0 %v484_v17  ;;  %504 = vmax.xlane.f32.xlu1 %v503_v18  ;;  %v491_v29 = vsel %vm490_vm1, %v2168_v23, -inf  ;;  %v494_v30 = vsel %vm483_vm0, %v2171_v24, -inf  ;;  %v424_v31 = vunpack.c.l.bf16 %v394_v25  ;;  %v425_v32 = vunpack.c.l.bf16 %v395_v26  ;;  %v409_v18 = vld [vmem:[%s2135_s15 + $0x5c] sm:$0x1] }
  0x1e   : > { %v497_v34 = vsel %vm483_vm0, %v2176_v27, -inf  ;;  %v500_v35 = vsel %vm490_vm1, %v2179_v28, -inf  ;;  %v426_v38 = vunpack.c.h.bf16 %v395_v26  ;;  %v427_v39 = vunpack.c.l.bf16 %v397_v33 }
  0x1f   : > { %v2191_v36 = vadd.f32 %v2140_v1, %v424_v31  ;;  %v2194_v37 = vadd.f32 %v2140_v1, %v425_v32  ;;  %v1752_v41 = vunpack.c.l.bf16 %v1783_v40  ;;  %v1753_v42 = vunpack.c.h.bf16 %v1783_v40 }
  0x20   : > { %v2202_v45 = vadd.f32 %v2140_v1, %v426_v38  ;;  %v2205_v46 = vadd.f32 %v2140_v1, %v427_v39  ;;  %v430_v49 = vunpack.c.l.bf16 %v400_v47  ;;  %v431_v50 = vunpack.c.l.bf16 %v401_v48  ;;  %v412_v38 = vld [vmem:[%s2135_s15 + $0x68] sm:$0x1]  ;;  %v413_v39 = vld [vmem:[%s2135_s15 + $0x6c] sm:$0xff]  }
  0x21   : > { %488 = vmax.xlane.f32.xlu0 %v487_v21  ;;  %507 = vmax.xlane.f32.xlu1 %v506_v22  ;;  %v509_v43 = vsel %vm490_vm1, %v2191_v36, -inf  ;;  %v512_v44 = vsel %vm483_vm0, %v2194_v37, -inf  ;;  %v2214_v53 = vadd.f32 %v1752_v41, %v2140_v1  ;;  %v2217_v54 = vadd.f32 %v1753_v42, %v2140_v1 }
  0x22   : > { %v515_v51 = vsel %vm483_vm0, %v2202_v45, -inf  ;;  %v518_v52 = vsel %vm490_vm1, %v2205_v46, -inf  ;;  %v2221_v56 = vadd.f32 %v2140_v1, %v430_v49  ;;  %v432_v57 = vunpack.c.h.bf16 %v401_v48  ;;  %v415_v48 = vld [vmem:[%s2135_s15 + $0x74] sm:$0x1] }
  0x23   : > { %v521_v58 = vsel %vm483_vm0, %v2214_v53, -inf  ;;  %v524_v59 = vsel %vm483_vm0, %v2217_v54, -inf  ;;  %v2228_v60 = vadd.f32 %v2140_v1, %v431_v50  ;;  %v433_v61 = vunpack.c.l.bf16 %v403_v55 }
  0x24   : > { %v527_v63 = vsel %vm490_vm1, %v2221_v56, -inf  ;;  %v2234_v0 = vadd.f32 %v2140_v1, %v432_v57  ;;  %v1756_v4 = vunpack.c.l.bf16 %v1784_v62  ;;  %v1757_v5 = vunpack.c.h.bf16 %v1784_v62 }
  0x25   : > { %492 = vmax.xlane.f32.xlu0 %v491_v29  ;;  %495 = vmax.xlane.f32.xlu1 %v494_v30  ;;  %v530_v2 = vsel %vm483_vm0, %v2228_v60, -inf  ;;  %v2239_v3 = vadd.f32 %v2140_v1, %v433_v61  ;;  %v436_v8 = vunpack.c.l.bf16 %v406_v6  ;;  %v437_v9 = vunpack.c.l.bf16 %v407_v7  ;;  %v1785_v29 = vld [vmem:[%s2135_s15 + $0x60] sm:$0xff]  }
  0x26   : > { %v533_v10 = vsel %vm483_vm0, %v2234_v0, -inf  ;;  %v2248_v16 = vadd.f32 %v1756_v4, %v2140_v1  ;;  %v2251_v17 = vadd.f32 %v1757_v5, %v2140_v1  ;;  %v438_v20 = vunpack.c.h.bf16 %v407_v7 }
  0x27   : > { %v536_v11 = vsel %vm490_vm1, %v2239_v3, -inf  ;;  %v2255_v19 = vadd.f32 %v2140_v1, %v436_v8  ;;  %v2262_v25 = vadd.f32 %v2140_v1, %v437_v9  ;;  %v439_v26 = vunpack.c.l.bf16 %v409_v18 }
  0x28   : > { %v539_v21 = vsel %vm483_vm0, %v2248_v16, -inf  ;;  %v542_v22 = vsel %vm483_vm0, %v2251_v17, -inf  ;;  %v2266_v30 = vadd.f32 %v2140_v1, %v438_v20  ;;  %v1760_v31 = vunpack.c.l.bf16 %v1785_v29 }
  0x29   : > { %498 = vmax.xlane.f32.xlu0 %v497_v34  ;;  %501 = vmax.xlane.f32.xlu1 %v500_v35  ;;  %v545_v32 = vsel %vm490_vm1, %v2255_v19, -inf  ;;  %v548_v33 = vsel %vm483_vm0, %v2262_v25, -inf  ;;  %v2273_v34 = vadd.f32 %v2140_v1, %v439_v26  ;;  %v1761_v35 = vunpack.c.h.bf16 %v1785_v29 }
  0x2a   : > { %v551_v40 = vsel %vm483_vm0, %v2266_v30, -inf  ;;  %v2280_v41 = vadd.f32 %v1760_v31, %v2140_v1  ;;  %v443_v47 = vunpack.c.l.bf16 %v413_v39  ;;  %v444_v49 = vunpack.c.h.bf16 %v413_v39 }
  0x2b   : > { %v554_v42 = vsel %vm490_vm1, %v2273_v34, -inf  ;;  %v445_v50 = vunpack.c.l.bf16 %v415_v48 }
  0x2c   : > { %v2296_v57 = vadd.f32 %v2140_v1, %v443_v47  ;;  %v2303_v61 = vadd.f32 %v2140_v1, %v444_v49 }
  0x2d   : > { %510 = vmax.xlane.f32.xlu0 %v509_v43  ;;  %513 = vmax.xlane.f32.xlu1 %v512_v44  ;;  %v2285_v43 = vadd.f32 %v1761_v35, %v2140_v1  ;;  %v442_v44 = vunpack.c.l.bf16 %v412_v38  ;;  %v2306_v62 = vadd.f32 %v2140_v1, %v445_v50 }
  0x2f   : > { %v2293_v55 = vadd.f32 %v2140_v1, %v442_v44 }
  0x31   : > { %516 = vmax.xlane.f32.xlu0 %v515_v51  ;;  %519 = vmax.xlane.f32.xlu1 %v518_v52  ;;  %v557_v51 = vsel %vm483_vm0, %v2280_v41, -inf  ;;  %v560_v52 = vsel %vm483_vm0, %v2285_v43, -inf }
  0x35   : > { %522 = vmax.xlane.f32.xlu0 %v521_v58  ;;  %525 = vmax.xlane.f32.xlu1 %v524_v59  ;;  %v563_v58 = vsel %vm490_vm1, %v2293_v55, -inf  ;;  %v566_v59 = vsel %vm483_vm0, %v2296_v57, -inf }
  0x39   : > { %528 = vmax.xlane.f32.xlu0 %v527_v63  ;;  %531 = vmax.xlane.f32.xlu1 %v530_v2  ;;  %v569_v63 = vsel %vm483_vm0, %v2303_v61, -inf  ;;  %v572_v2 = vsel %vm490_vm1, %v2306_v62, -inf }
  0x3d   : > { %534 = vmax.xlane.f32.xlu0 %v533_v10  ;;  %537 = vmax.xlane.f32.xlu1 %v536_v11 }
  0x41   : > { %540 = vmax.xlane.f32.xlu0 %v539_v21  ;;  %543 = vmax.xlane.f32.xlu1 %v542_v22 }
  0x45   : > { %546 = vmax.xlane.f32.xlu0 %v545_v32  ;;  %549 = vmax.xlane.f32.xlu1 %v548_v33 }
  0x49   : > { %552 = vmax.xlane.f32.xlu0 %v551_v40  ;;  %555 = vmax.xlane.f32.xlu1 %v554_v42 }
  0x4d   : > { %558 = vmax.xlane.f32.xlu0 %v557_v51  ;;  %561 = vmax.xlane.f32.xlu1 %v560_v52 }
  0x51   : > { %564 = vmax.xlane.f32.xlu0 %v563_v58  ;;  %567 = vmax.xlane.f32.xlu1 %v566_v59 }
  0x55   : > { %570 = vmax.xlane.f32.xlu0 %v569_v63  ;;  %573 = vmax.xlane.f32.xlu1 %v572_v2 }
  0xaa   : > { %v486_v4 = vpop.xlane.xlu0 %485  ;;  %v505_v5 = vpop.xlane.xlu1 %504 }
  0xab   : > { %v575_v6 = vsub.f32 %v2147_v12, %v486_v4  ;;  %v581_v7 = vsub.f32 %v2150_v13, %v505_v5 }
  0xad   : > { %v605_v8 = vmul.f32 1.442695, %v575_v6  ;;  %v617_v9 = vmul.f32 1.442695, %v581_v7 }
  0xae   : > { %v489_v1 = vpop.xlane.xlu0 %488  ;;  %v508_v10 = vpop.xlane.xlu1 %507 }
  0xaf   : > { %1884 = vpow2.f32 %v605_v8  ;;  %v576_v11 = vsub.f32 %v2153_v14, %v489_v1  ;;  %v582_v18 = vsub.f32 %v2156_v15, %v508_v10 }
  0xb0   : > { %1886 = vpow2.f32 %v617_v9 }
  0xb1   : > { %v607_v20 = vmul.f32 1.442695, %v576_v11  ;;  %v619_v21 = vmul.f32 1.442695, %v582_v18 }
  0xb2   : > { %v493_v22 = vpop.xlane.xlu0 %492  ;;  %v496_v26 = vpop.xlane.xlu1 %495 }
  0xb3   : > { %1888 = vpow2.f32 %v607_v20  ;;  %v577_v29 = vsub.f32 %v2168_v23, %v493_v22  ;;  %v578_v12 = vsub.f32 %v2171_v24, %v496_v26 }
  0xb4   : > { %1890 = vpow2.f32 %v619_v21 }
  0xb5   : > { %v609_v13 = vmul.f32 1.442695, %v577_v29  ;;  %v611_v31 = vmul.f32 1.442695, %v578_v12 }
  0xb6   : > { %v499_v32 = vpop.xlane.xlu0 %498  ;;  %v502_v33 = vpop.xlane.xlu1 %501 }
  0xb7   : > { %1892 = vpow2.f32 %v609_v13  ;;  %v579_v14 = vsub.f32 %v2176_v27, %v499_v32  ;;  %v580_v15 = vsub.f32 %v2179_v28, %v502_v33 }
  0xb8   : > { %1894 = vpow2.f32 %v611_v31 }
  0xb9   : > { %v2320_v35 = vpop.eup %1884  ;;  %v613_v38 = vmul.f32 1.442695, %v579_v14  ;;  %v615_v39 = vmul.f32 1.442695, %v580_v15 }
  0xba   : > { %v2322_v40 = vpop.eup %1886  ;;  %v511_v23 = vpop.xlane.xlu0 %510  ;;  %v665_v24 = vsel %vm483_vm0, %v2320_v35, 0.0 }
  0xbb   : > { %v514_v42 = vpop.xlane.xlu1 %513  ;;  %1896 = vpow2.f32 %v613_v38  ;;  %v583_v44 = vsub.f32 %v2191_v36, %v511_v23  ;;  %666 = vadd.xlane.f32.xlu0 %v665_v24  ;;  %v683_v28 = vsel %vm483_vm0, %v2322_v40, 0.0 }
  0xbc   : > { %v584_v27 = vsub.f32 %v2194_v37, %v514_v42  ;;  %1898 = vpow2.f32 %v615_v39 }
  0xbd   : > { %v2330_v47 = vpop.eup %1888  ;;  %v621_v48 = vmul.f32 1.442695, %v583_v44 }
  0xbe   : > { %v623_v49 = vmul.f32 1.442695, %v584_v27  ;;  %v2332_v50 = vpop.eup %1890  ;;  %v517_v51 = vpop.xlane.xlu0 %516  ;;  %v668_v52 = vsel %vm483_vm0, %v2330_v47, 0.0 }
  0xbf   : > { %v520_v58 = vpop.xlane.xlu1 %519  ;;  %1900 = vpow2.f32 %v621_v48  ;;  %v585_v36 = vsub.f32 %v2202_v45, %v517_v51  ;;  %684 = vadd.xlane.f32.xlu0 %v683_v28  ;;  %669 = vadd.xlane.f32.xlu1 %v668_v52  ;;  %v686_v59 = vsel %vm483_vm0, %v2332_v50, 0.0 }
  0xc0   : > { %v586_v37 = vsub.f32 %v2205_v46, %v520_v58  ;;  %1902 = vpow2.f32 %v623_v49 }
  0xc1   : > { %v2340_v63 = vpop.eup %1892  ;;  %v625_v2 = vmul.f32 1.442695, %v585_v36 }
  0xc2   : > { %v627_v4 = vmul.f32 1.442695, %v586_v37  ;;  %v2342_v5 = vpop.eup %1894  ;;  %v523_v6 = vpop.xlane.xlu0 %522  ;;  %v671_v7 = vsel %vm490_vm1, %v2340_v63, 0.0 }
  0xc3   : > { %v526_v8 = vpop.xlane.xlu1 %525  ;;  %1904 = vpow2.f32 %v625_v2  ;;  %v587_v45 = vsub.f32 %v2214_v53, %v523_v6  ;;  %687 = vadd.xlane.f32.xlu1 %v686_v59  ;;  %672 = vadd.xlane.f32.xlu0 %v671_v7  ;;  %v674_v9 = vsel %vm483_vm0, %v2342_v5, 0.0 }
  0xc4   : > { %v588_v46 = vsub.f32 %v2217_v54, %v526_v8  ;;  %1906 = vpow2.f32 %v627_v4 }
  0xc5   : > { %v2350_v1 = vpop.eup %1896  ;;  %v629_v10 = vmul.f32 1.442695, %v587_v45 }
  0xc6   : > { %v631_v11 = vmul.f32 1.442695, %v588_v46  ;;  %v2352_v18 = vpop.eup %1898  ;;  %v529_v20 = vpop.xlane.xlu0 %528  ;;  %v677_v21 = vsel %vm483_vm0, %v2350_v1, 0.0 }
  0xc7   : > { %v532_v22 = vpop.xlane.xlu1 %531  ;;  %1908 = vpow2.f32 %v629_v10  ;;  %v589_v53 = vsub.f32 %v2221_v56, %v529_v20  ;;  %675 = vadd.xlane.f32.xlu1 %v674_v9  ;;  %678 = vadd.xlane.f32.xlu0 %v677_v21  ;;  %v680_v26 = vsel %vm490_vm1, %v2352_v18, 0.0 }
  0xc8   : > { %v590_v54 = vsub.f32 %v2228_v60, %v532_v22  ;;  %1910 = vpow2.f32 %v631_v11 }
  0xc9   : > { %v2360_v29 = vpop.eup %1900  ;;  %v633_v12 = vmul.f32 1.442695, %v589_v53 }
  0xca   : > { %v635_v13 = vmul.f32 1.442695, %v590_v54  ;;  %v2362_v31 = vpop.eup %1902  ;;  %v535_v32 = vpop.xlane.xlu0 %534  ;;  %v689_v33 = vsel %vm490_vm1, %v2360_v29, 0.0 }
  0xcb   : > { %v538_v14 = vpop.xlane.xlu1 %537  ;;  %1912 = vpow2.f32 %v633_v12  ;;  %v591_v56 = vsub.f32 %v2234_v0, %v535_v32  ;;  %681 = vadd.xlane.f32.xlu1 %v680_v26  ;;  %690 = vadd.xlane.f32.xlu0 %v689_v33  ;;  %v692_v15 = vsel %vm483_vm0, %v2362_v31, 0.0 }
  0xcc   : > { %v592_v60 = vsub.f32 %v2239_v3, %v538_v14  ;;  %1914 = vpow2.f32 %v635_v13 }
  0xcd   : > { %v2370_v38 = vpop.eup %1904  ;;  %v637_v39 = vmul.f32 1.442695, %v591_v56 }
  0xce   : > { %v639_v23 = vmul.f32 1.442695, %v592_v60  ;;  %v2372_v24 = vpop.eup %1906  ;;  %v541_v42 = vpop.xlane.xlu0 %540  ;;  %v695_v44 = vsel %vm483_vm0, %v2370_v38, 0.0 }
  0xcf   : > { %v544_v27 = vpop.xlane.xlu1 %543  ;;  %1916 = vpow2.f32 %v637_v39  ;;  %v593_v0 = vsub.f32 %v2248_v16, %v541_v42  ;;  %693 = vadd.xlane.f32.xlu1 %v692_v15  ;;  %696 = vadd.xlane.f32.xlu0 %v695_v44  ;;  %v698_v28 = vsel %vm490_vm1, %v2372_v24, 0.0 }
  0xd0   : > { %v594_v3 = vsub.f32 %v2251_v17, %v544_v27  ;;  %1918 = vpow2.f32 %v639_v23 }
  0xd1   : > { %v2380_v48 = vpop.eup %1908  ;;  %v641_v49 = vmul.f32 1.442695, %v593_v0 }
  0xd2   : > { %v643_v51 = vmul.f32 1.442695, %v594_v3  ;;  %v2382_v52 = vpop.eup %1910  ;;  %v547_v58 = vpop.xlane.xlu0 %546  ;;  %v701_v36 = vsel %vm483_vm0, %v2380_v48, 0.0 }
  0xd3   : > { %v550_v37 = vpop.xlane.xlu1 %549  ;;  %1920 = vpow2.f32 %v641_v49  ;;  %v595_v16 = vsub.f32 %v2255_v19, %v547_v58  ;;  %699 = vadd.xlane.f32.xlu1 %v698_v28  ;;  %702 = vadd.xlane.f32.xlu0 %v701_v36  ;;  %v704_v59 = vsel %vm483_vm0, %v2382_v52, 0.0 }
  0xd4   : > { %v596_v17 = vsub.f32 %v2262_v25, %v550_v37  ;;  %1922 = vpow2.f32 %v643_v51 }
  0xd5   : > { %v2390_v2 = vpop.eup %1912  ;;  %v645_v4 = vmul.f32 1.442695, %v595_v16 }
  0xd6   : > { %v647_v6 = vmul.f32 1.442695, %v596_v17  ;;  %v2392_v7 = vpop.eup %1914  ;;  %v553_v8 = vpop.xlane.xlu0 %552  ;;  %v707_v45 = vsel %vm490_vm1, %v2390_v2, 0.0 }
  0xd7   : > { %v556_v46 = vpop.xlane.xlu1 %555  ;;  %1924 = vpow2.f32 %v645_v4  ;;  %v597_v19 = vsub.f32 %v2266_v30, %v553_v8  ;;  %705 = vadd.xlane.f32.xlu1 %v704_v59  ;;  %708 = vadd.xlane.f32.xlu0 %v707_v45  ;;  %v710_v9 = vsel %vm483_vm0, %v2392_v7, 0.0 }
  0xd8   : > { %v598_v25 = vsub.f32 %v2273_v34, %v556_v46  ;;  %1926 = vpow2.f32 %v647_v6 }
  0xd9   : > { %v2400_v10 = vpop.eup %1916  ;;  %v649_v11 = vmul.f32 1.442695, %v597_v19 }
  0xda   : > { %v651_v20 = vmul.f32 1.442695, %v598_v25  ;;  %v2402_v21 = vpop.eup %1918  ;;  %v559_v22 = vpop.xlane.xlu0 %558  ;;  %v713_v53 = vsel %vm483_vm0, %v2400_v10, 0.0 }
  0xdb   : > { %v562_v54 = vpop.xlane.xlu1 %561  ;;  %1928 = vpow2.f32 %v649_v11  ;;  %v599_v30 = vsub.f32 %v2280_v41, %v559_v22  ;;  %711 = vadd.xlane.f32.xlu1 %v710_v9  ;;  %714 = vadd.xlane.f32.xlu0 %v713_v53  ;;  %v716_v26 = vsel %vm490_vm1, %v2402_v21, 0.0 }
  0xdc   : > { %v600_v34 = vsub.f32 %v2285_v43, %v562_v54  ;;  %1930 = vpow2.f32 %v651_v20 }
  0xdd   : > { %v2410_v12 = vpop.eup %1920  ;;  %v653_v13 = vmul.f32 1.442695, %v599_v30 }
  0xde   : > { %v655_v32 = vmul.f32 1.442695, %v600_v34  ;;  %v2412_v33 = vpop.eup %1922  ;;  %v565_v14 = vpop.xlane.xlu0 %564  ;;  %v719_v56 = vsel %vm483_vm0, %v2410_v12, 0.0  ;;  %v1763_v34 = vld [vmem:[%s2467_s20] sm:$0xff]  }
  0xdf   : > { %v568_v60 = vpop.xlane.xlu1 %567  ;;  %1932 = vpow2.f32 %v653_v13  ;;  %v601_v41 = vsub.f32 %v2293_v55, %v565_v14  ;;  %717 = vadd.xlane.f32.xlu1 %v716_v26  ;;  %720 = vadd.xlane.f32.xlu0 %v719_v56  ;;  %v722_v15 = vsel %vm483_vm0, %v2412_v33, 0.0  ;;  %v1765_v56 = vunpack.c.h.bf16 %v1763_v34 }
  0xe0   : > { %v602_v43 = vsub.f32 %v2296_v57, %v568_v60  ;;  %1934 = vpow2.f32 %v655_v32  ;;  %v1764_v32 = vunpack.c.l.bf16 %v1763_v34  ;;  %v1786_v60 = vld [vmem:[%s2467_s20 + $0x18] sm:$0xff]  }
  0xe1   : > { %v2420_v39 = vpop.eup %1924  ;;  %v657_v23 = vmul.f32 1.442695, %v601_v41 }
  0xe2   : > { %v659_v42 = vmul.f32 1.442695, %v602_v43  ;;  %v2422_v44 = vpop.eup %1926  ;;  %v571_v27 = vpop.xlane.xlu0 %570  ;;  %v725_v0 = vsel %vm490_vm1, %v2420_v39, 0.0 }
  0xe3   : > { %v574_v3 = vpop.xlane.xlu1 %573  ;;  %1936 = vpow2.f32 %v657_v23  ;;  %v603_v55 = vsub.f32 %v2303_v61, %v571_v27  ;;  %723 = vadd.xlane.f32.xlu1 %v722_v15  ;;  %726 = vadd.xlane.f32.xlu0 %v725_v0  ;;  %v728_v28 = vsel %vm483_vm0, %v2422_v44, 0.0  ;;  %v1768_v27 = vunpack.c.l.bf16 %v1786_v60 }
  0xe4   : > { %v604_v57 = vsub.f32 %v2306_v62, %v574_v3  ;;  %1938 = vpow2.f32 %v659_v42  ;;  %v1769_v0 = vunpack.c.h.bf16 %v1786_v60  ;;  %v818_v3 = vld [vmem:[%s2467_s20 + $0xc] sm:$0xff]   ;;  %v2512_v60 = vld [vmem:[%s2467_s20 + $0x44] sm:$0x1] }
  0xe5   : > { %v2430_v49 = vpop.eup %1928  ;;  %v661_v51 = vmul.f32 1.442695, %v603_v55  ;;  %v2475_v55 = vld [vmem:[%s2467_s20 + $0x8] sm:$0x1] }
  0xe6   : > { %v663_v58 = vmul.f32 1.442695, %v604_v57  ;;  %v2432_v36 = vpop.eup %1930  ;;  %v731_v37 = vsel %vm483_vm0, %v2430_v49, 0.0 }
  0xe7   : > { %1940 = vpow2.f32 %v661_v51  ;;  %729 = vadd.xlane.f32.xlu1 %v728_v28  ;;  %732 = vadd.xlane.f32.xlu0 %v731_v37  ;;  %v734_v61 = vsel %vm490_vm1, %v2432_v36, 0.0  ;;  %v2479_v51 = vld [vmem:[%s2467_s20 + $0x20] sm:$0x1]  ;;  %v2485_v37 = vld [vmem:[%s2467_s20 + $0x24] sm:$0xff]  }
  0xe8   : > { %1942 = vpow2.f32 %v663_v58  ;;  %v2482_v58 = vld [vmem:[%s2467_s20 + $0x14] sm:$0x1]  ;;  %v854_v34 = vunpack.c.l.bf16 %v2485_v37 }
  0xe9   : > { %v2438_v62 = vpop.eup %1932 }
  0xea   : > { %v2440_v16 = vpop.eup %1934  ;;  %v737_v17 = vsel %vm483_vm0, %v2438_v62, 0.0 }
  0xeb   : > { %735 = vadd.xlane.f32.xlu1 %v734_v61  ;;  %738 = vadd.xlane.f32.xlu0 %v737_v17  ;;  %v740_v59 = vsel %vm483_vm0, %v2440_v16, 0.0 }
  0xed   : > { %v2446_v4 = vpop.eup %1936 }
  0xee   : > { %v2448_v6 = vpop.eup %1938  ;;  %v743_v8 = vsel %vm490_vm1, %v2446_v4, 0.0 }
  0xef   : > { %741 = vadd.xlane.f32.xlu1 %v740_v59  ;;  %744 = vadd.xlane.f32.xlu0 %v743_v8  ;;  %v746_v45 = vsel %vm483_vm0, %v2448_v6, 0.0  ;;  %v848_v59 = vunpack.c.l.bf16 %v818_v3 }
  0xf1   : > { %v2454_v46 = vpop.eup %1940 }
  0xf2   : > { %v2456_v19 = vpop.eup %1942  ;;  %v749_v25 = vsel %vm483_vm0, %v2454_v46, 0.0 }
  0xf3   : > { %747 = vadd.xlane.f32.xlu1 %v746_v45  ;;  %750 = vadd.xlane.f32.xlu0 %v749_v25  ;;  %v752_v9 = vsel %vm490_vm1, %v2456_v19, 0.0  ;;  %v2489_v25 = vld [vmem:[%s2467_s20 + $0x2c] sm:$0x1] }
  0xf7   : > { %753 = vadd.xlane.f32.xlu1 %v752_v9  ;;  %v2492_v9 = vld [vmem:[%s2467_s20 + $0x30] sm:$0xff]  }
 0x148   : > { %v667_v11 = vpop.xlane.xlu0 %666 }
 0x149   : > { %1944 = vrcp.f32 %v667_v11 }
 0x14c   : > { %v670_v20 = vpop.xlane.xlu1 %669  ;;  %v685_v22 = vpop.xlane.xlu0 %684 }
 0x14d   : > { %1946 = vrcp.f32 %v670_v20  ;;  %v849_v20 = vunpack.c.h.bf16 %v818_v3  ;;  %v1773_v3 = vunpack.c.h.bf16 %v2492_v9 }
 0x14e   : > { %1948 = vrcp.f32 %v685_v22  ;;  %v853_v22 = vunpack.c.l.bf16 %v2479_v51 }
 0x150   : > { %v688_v53 = vpop.xlane.xlu1 %687  ;;  %v673_v54 = vpop.xlane.xlu0 %672 }
 0x151   : > { %1950 = vrcp.f32 %v688_v53  ;;  %v2499_v53 = vld [vmem:[%s2467_s20 + $0x38] sm:$0x1] }
 0x152   : > { %1952 = vrcp.f32 %v673_v54 }
 0x153   : > { %v1945_v30 = vpop.eup %1944 }
 0x154   : > { %v676_v26 = vpop.xlane.xlu1 %675  ;;  %v679_v13 = vpop.xlane.xlu0 %678  ;;  %v785_v14 = vmul.f32 %v1945_v30, %v2320_v35 }
 0x155   : > { %1954 = vrcp.f32 %v676_v26  ;;  %v2504_v26 = vld [vmem:[%s2467_s20 + $0x3c] sm:$0xff]  }
 0x156   : > { %1956 = vrcp.f32 %v679_v13  ;;  %v875_v35 = vmul.f32 %v1764_v32, %v785_v14  ;;  %v855_v32 = vunpack.c.h.bf16 %v2485_v37  ;;  %v856_v14 = vunpack.c.l.bf16 %v2489_v25 }
 0x157   : > { %v1947_v41 = vpop.eup %1946 }
 0x158   : > { %v1949_v43 = vpop.eup %1948  ;;  %v786_v15 = vmul.f32 %v1947_v41, %v2330_v47  ;;  %v682_v23 = vpop.xlane.xlu1 %681  ;;  %v2515_v41 = vld [vmem:[%s2467_s20 + $0x48] sm:$0xff]  }
 0x159   : > { %v691_v42 = vpop.xlane.xlu0 %690  ;;  %1958 = vrcp.f32 %v682_v23  ;;  %v791_v28 = vmul.f32 %v1949_v43, %v2322_v40  ;;  %v847_v40 = vunpack.c.l.bf16 %v2475_v55  ;;  %v859_v55 = vunpack.c.l.bf16 %v2499_v53 }
 0x15a   : > { %v876_v57 = vmul.f32 %v1765_v56, %v786_v15  ;;  %1960 = vrcp.f32 %v691_v42  ;;  %v1772_v56 = vunpack.c.l.bf16 %v2492_v9 }
 0x15b   : > { %v1951_v47 = vpop.eup %1950  ;;  %v881_v54 = vmul.f32 %v1768_v27, %v791_v28 }
 0x15c   : > { %v1953_v61 = vpop.eup %1952  ;;  %v792_v17 = vmul.f32 %v1951_v47, %v2332_v50  ;;  %v694_v8 = vpop.xlane.xlu1 %693  ;;  %v2495_v11 = vpack.c.bf16 %v876_v57, %v875_v35  ;;  %v850_v50 = vunpack.c.l.bf16 %v2482_v58  ;;  %v2524_v35 = vld [vmem:[%s2467_s20 + $0x50] sm:$0x1]  ;;  %v2530_v58 = vld [vmem:[%s2467_s20 + $0x54] sm:$0xff]   ;;  %v2549_v47 = vld [vmem:[%s2467_s20 + $0x68] sm:$0x1] }
 0x15d   : > { %v697_v45 = vpop.xlane.xlu0 %696  ;;  %1962 = vrcp.f32 %v694_v8  ;;  %v787_v43 = vmul.f32 %v1953_v61, %v2340_v63  ;;  %v2539_v61 = vld [vmem:[%s2467_s20 + $0x5c] sm:$0x1] }
 0x15e   : > { %v882_v30 = vmul.f32 %v1769_v0, %v792_v17  ;;  %1964 = vrcp.f32 %v697_v45  ;;  %925 = vst.msk [vmem:[#allocation2] sm:$0xff] %vm483_vm0, %v2495_v11 }
 0x15f   : > { %v1955_v13 = vpop.eup %1954 }
 0x160   : > { %v1957_v15 = vpop.eup %1956  ;;  %v2518_v23 = vpack.c.bf16 %v882_v30, %v881_v54  ;;  %v788_v42 = vmul.f32 %v1955_v13, %v2342_v5  ;;  %v700_v27 = vpop.xlane.xlu1 %699  ;;  %v2544_v30 = vld [vmem:[%s2467_s20 + $0x60] sm:$0xff]  }
 0x161   : > { %v703_v0 = vpop.xlane.xlu0 %702  ;;  %v789_v57 = vmul.f32 %v1957_v15, %v2350_v1  ;;  %1966 = vrcp.f32 %v700_v27 }
 0x162   : > { %927 = vst.msk [vmem:[#allocation2 + $0x30] sm:$0xff] %vm483_vm0, %v2518_v23  ;;  %v878_v5 = vmul.f32 %v848_v59, %v788_v42  ;;  %1968 = vrcp.f32 %v703_v0  ;;  %1236 = vrot.lane.b32.xlu1 %v2518_v23, %s2044_s21  ;;  %v877_v59 = vmul.f32 %v847_v40, %v787_v43 }
 0x163   : > { %v1959_v17 = vpop.eup %1958  ;;  %v879_v8 = vmul.f32 %v849_v20, %v789_v57  ;;  %v961_v20 = vshll.u32 %v2518_v23, 16 }
 0x164   : > { %v1961_v13 = vpop.eup %1960  ;;  %v706_v15 = vpop.xlane.xlu1 %705  ;;  %v790_v1 = vmul.f32 %v1959_v17, %v2352_v18 }
 0x165   : > { %v709_v42 = vpop.xlane.xlu0 %708  ;;  %v793_v57 = vmul.f32 %v1961_v13, %v2360_v29  ;;  %1970 = vrcp.f32 %v706_v15  ;;  %v2554_v54 = vpack.c.bf16 %v879_v8, %v878_v5  ;;  %v2565_v29 = vpack.c.bf16 %v877_v59, %v877_v59 }
 0x166   : > { %1972 = vrcp.f32 %v709_v42  ;;  %v880_v0 = vmul.f32 %v850_v50, %v790_v1  ;;  %v963_v15 = vrot.slane %v961_v20, 1 }
 0x167   : > { %v1963_v45 = vpop.eup %1962  ;;  %v883_v18 = vmul.f32 %v853_v22, %v793_v57  ;;  %1138 = vrot.lane.b32.xlu1 %v2554_v54, %s2045_s22  ;;  %926 = vst.msk [vmem:[#allocation2 + $0x18] sm:$0xff] %vm483_vm0, %v2554_v54  ;;  %v949_v17 = vshll.u32 %v2554_v54, 16  ;;  %v959_v22 = vshrl.u32 %v2518_v23, 16  ;;  %v947_v27 = vshrl.u32 %v2554_v54, 16 }
 0x168   : > { %v1965_v8 = vpop.eup %1964  ;;  %v794_v50 = vmul.f32 %v1963_v45, %v2362_v31  ;;  %v712_v1 = vpop.xlane.xlu1 %711  ;;  %v2570_v51 = vpack.c.bf16 %v880_v0, %v880_v0  ;;  %v1086_v0 = vrot.slane %v2518_v23, 1 }
 0x169   : > { %v715_v13 = vpop.xlane.xlu0 %714  ;;  %v910_v42 = vpack.c.bf16 %v883_v18, %v883_v18  ;;  %v795_v57 = vmul.f32 %v1965_v8, %v2370_v38  ;;  %1974 = vrcp.f32 %v712_v1  ;;  %v951_v59 = vrot.slane %v949_v17, 1 }
 0x16a   : > { %v884_v5 = vmul.f32 %v854_v34, %v794_v50  ;;  %1976 = vrcp.f32 %v715_v13  ;;  %v954_v31 = vshll.u32 %v2570_v51, 16  ;;  %v964_v13 = vor.u32 %v963_v15, %v959_v22 }
 0x16b   : > { %v1967_v45 = vpop.eup %1966  ;;  %v1087_v43 = vrot.slane %v910_v42, 1  ;;  %v885_v20 = vmul.f32 %v855_v32, %v795_v57  ;;  %1140 = vrot.lane.b32.xlu1 %v2518_v23, %s2045_s22  ;;  %v966_v38 = vshll.u32 %v910_v42, 16  ;;  %v952_v50 = vor.u32 %v951_v59, %v947_v27 }
 0x16c   : > { %v1969_v18 = vpop.eup %1968  ;;  %v796_v17 = vmul.f32 %v1967_v45, %v2372_v24  ;;  %v718_v34 = vpop.xlane.xlu1 %717  ;;  %v956_v1 = vrot.slane %v954_v31, 1  ;;  %v1081_v27 = vrot.slane %v2565_v29, 1 }
 0x16d   : > { %v721_v8 = vpop.xlane.xlu0 %720  ;;  %v2585_v40 = vsel %vm1079_vm2, %v1086_v0, %v1087_v43  ;;  %v911_v28 = vpack.c.bf16 %v885_v20, %v884_v5  ;;  %v797_v63 = vmul.f32 %v1969_v18, %v2380_v48  ;;  %1978 = vrcp.f32 %v718_v34 }
 0x16e   : > { %1324 = vst.msk [vmem:[#allocation2 + $0x10] sm:$0xff] %vm483_vm0, %v2585_v40  ;;  %v886_v37 = vmul.f32 %v856_v14, %v796_v17  ;;  %1980 = vrcp.f32 %v721_v8  ;;  %v2593_v24 = vsel %vm933_vm3, %v952_v50, %v956_v1  ;;  %v968_v32 = vrot.slane %v966_v38, 1 }
 0x16f   : > { %v1971_v23 = vpop.eup %1970  ;;  %928 = vst.msk [vmem:[#allocation2 + $0x48] sm:$0xff] %vm483_vm0, %v911_v28  ;;  %1142 = vrot.lane.b32.xlu1 %v911_v28, %s2045_s22  ;;  %1238 = vrot.lane.b32.xlu0 %v911_v28, %s2044_s21  ;;  %v1080_v48 = vrot.slane %v2495_v11, 1  ;;  %v937_v43 = vshll.u32 %v2495_v11, 16  ;;  %1191 = vst.msk [vmem:[#allocation2 + $0x8] sm:$0xff] %vm483_vm0, %v2593_v24  ;;  %v973_v25 = vshll.u32 %v911_v28, 16  ;;  %v1089_v22 = vrot.slane %v911_v28, 1 }
 0x170   : > { %v1973_v14 = vpop.eup %1972  ;;  %v912_v5 = vpack.c.bf16 %v886_v37, %v886_v37  ;;  %v798_v15 = vmul.f32 %v1971_v23, %v2382_v52  ;;  %v724_v42 = vpop.xlane.xlu1 %723  ;;  %v2605_v59 = vsel %vm933_vm3, %v964_v13, %v968_v32  ;;  %v887_v31 = vmul.f32 %v1772_v56, %v797_v63 }
 0x171   : > { %v727_v57 = vpop.xlane.xlu0 %726  ;;  %v799_v45 = vmul.f32 %v1973_v14, %v2390_v2  ;;  %1982 = vrcp.f32 %v724_v42  ;;  %1192 = vst.msk [vmem:[#allocation2 + $0x20] sm:$0xff] %vm483_vm0, %v2605_v59  ;;  %v975_v0 = vrot.slane %v973_v25, 1  ;;  %v1083_v34 = vrot.slane %v2554_v54, 1 }
 0x172   : > { %v1090_v20 = vrot.slane %v912_v5, 1  ;;  %v888_v38 = vmul.f32 %v1773_v3, %v798_v15  ;;  %1984 = vrcp.f32 %v727_v57  ;;  %v978_v52 = vshll.u32 %v912_v5, 16 }
 0x173   : > { %v1975_v18 = vpop.eup %1974  ;;  %v889_v17 = vmul.f32 %v859_v55, %v799_v45  ;;  %v1084_v56 = vrot.slane %v2570_v51, 1  ;;  %v971_v2 = vshrl.u32 %v911_v28, 16  ;;  %v2963_v37 = vunpack.c.l.bf16 %v2504_v26 }
 0x174   : > { %v1977_v63 = vpop.eup %1976  ;;  %v2619_v8 = vsel %vm1079_vm2, %v1089_v22, %v1090_v20  ;;  %v913_v50 = vpack.c.bf16 %v888_v38, %v887_v31  ;;  %v800_v1 = vmul.f32 %v1975_v18, %v2392_v7  ;;  %v730_v9 = vpop.xlane.xlu1 %729  ;;  %v980_v13 = vrot.slane %v978_v52, 1 }
 0x175   : > { %v733_v3 = vpop.xlane.xlu0 %732  ;;  %1325 = vst.msk [vmem:[#allocation2 + $0x28] sm:$0xff] %vm483_vm0, %v2619_v8  ;;  %v914_v53 = vpack.c.bf16 %v889_v17, %v889_v17  ;;  %v801_v55 = vmul.f32 %v1977_v63, %v2400_v10  ;;  %1986 = vrcp.f32 %v730_v9  ;;  %v1342_v54 = vld [vmem:[#allocation2 + $0x10] sm:$0xff]  ;;  %v976_v51 = vor.u32 %v975_v0, %v971_v2 }
 0x176   : > { %929 = vst.msk [vmem:[#allocation2 + $0x60] sm:$0xff] %vm483_vm0, %v913_v50  ;;  %v1092_v28 = vrot.slane %v913_v50, 1  ;;  %v890_v32 = vmul.f32 %v2963_v37, %v800_v1  ;;  %1988 = vrcp.f32 %v733_v3  ;;  %1820 = vmatprep.subr.msk.bf16.mxu1 %vm483_vm0, %v1342_v54  ;;  %v1425_v7 = vsel %vm483_vm0, %v1342_v54, 0  ;;  %1144 = vrot.lane.b32.xlu1 %v913_v50, %s2045_s22 }
 0x177   : > { %v1979_v23 = vpop.eup %1978  ;;  %v1093_v25 = vrot.slane %v914_v53, 1  ;;  %v2964_v10 = vunpack.c.h.bf16 %v2504_v26  ;;  %1801 = vmatpush3.bf16.xpose.msra.mxu1 %v1425_v7  ;;  %1240 = vrot.lane.b32.xlu0 %v913_v50, %s2044_s21  ;;  %v1082_v5 = vsel %vm1079_vm2, %v1080_v48, %v1081_v27  ;;  %v2636_v22 = vsel %vm933_vm3, %v976_v51, %v980_v13 }
 0x178   : > { %v1981_v15 = vpop.eup %1980  ;;  %v802_v42 = vmul.f32 %v1979_v23, %v2402_v21  ;;  %v736_v57 = vpop.xlane.xlu1 %735  ;;  %v1085_v45 = vsel %vm1079_vm2, %v1083_v34, %v1084_v56  ;;  %1193 = vst.msk [vmem:[#allocation2 + $0x38] sm:$0xff] %vm483_vm0, %v2636_v22  ;;  %v985_v26 = vshll.u32 %v913_v50, 16  ;;  %v990_v0 = vshll.u32 %v914_v53, 16 }
 0x179   : > { %v891_v14 = vmul.f32 %v2964_v10, %v801_v55  ;;  %v739_v31 = vpop.xlane.xlu0 %738  ;;  %v2643_v20 = vsel %vm1079_vm2, %v1092_v28, %v1093_v25  ;;  %v803_v48 = vmul.f32 %v1981_v15, %v2410_v12  ;;  %1990 = vrcp.f32 %v736_v57 }
 0x17a   : > { %1326 = vst.msk [vmem:[#allocation2 + $0x40] sm:$0xff] %vm483_vm0, %v2643_v20  ;;  %v2965_v21 = vunpack.c.l.bf16 %v2512_v60  ;;  %1992 = vrcp.f32 %v739_v31  ;;  %1104 = vrot.lane.b32.xlu1 %v1082_v5, %s2044_s21  ;;  %v983_v52 = vshrl.u32 %v913_v50, 16  ;;  %v987_v18 = vrot.slane %v985_v26, 1 }
 0x17b   : > { %v2645_v38 = vpack.c.bf16 %v891_v14, %v890_v32  ;;  %v1983_v17 = vpop.eup %1982  ;;  %v2966_v12 = vunpack.c.l.bf16 %v2515_v41  ;;  %v992_v2 = vrot.slane %v990_v0, 1  ;;  %v2967_v32 = vunpack.c.h.bf16 %v2515_v41 }
 0x17c   : > { %v892_v27 = vmul.f32 %v2965_v21, %v802_v42  ;;  %v1985_v63 = vpop.eup %1984  ;;  %v804_v50 = vmul.f32 %v1983_v17, %v2412_v33  ;;  %v742_v9 = vpop.xlane.xlu1 %741  ;;  %v1345_v13 = vld [vmem:[#allocation2 + $0x28] sm:$0xff]  ;;  %v988_v53 = vor.u32 %v987_v18, %v983_v52  ;;  %v2968_v25 = vunpack.c.l.bf16 %v2524_v35 }
 0x17d   : > { %930 = vst.msk [vmem:[#allocation2 + $0x78] sm:$0xff] %vm483_vm0, %v2645_v38  ;;  %v1095_v34 = vrot.slane %v2645_v38, 1  ;;  %v893_v56 = vmul.f32 %v2966_v12, %v803_v48  ;;  %1242 = vrot.lane.b32.xlu0 %v2645_v38, %s2044_s21  ;;  %v997_v60 = vshll.u32 %v2645_v38, 16  ;;  %v745_v3 = vpop.xlane.xlu0 %744  ;;  %v995_v55 = vshrl.u32 %v2645_v38, 16  ;;  %1821 = vmatprep.subr.msk.bf16.mxu1 %vm483_vm0, %v1345_v13 }
 0x17e   : > { %v916_v1 = vpack.c.bf16 %v892_v27, %v892_v27  ;;  %v805_v54 = vmul.f32 %v1985_v63, %v2420_v39  ;;  %1994 = vrcp.f32 %v742_v9  ;;  %v1428_v51 = vsel %vm483_vm0, %v1345_v13, 0  ;;  %1106 = vrot.lane.b32.xlu1 %v1085_v45, %s2044_s21 }
 0x17f   : > { %v999_v28 = vrot.slane %v997_v60, 1  ;;  %v894_v7 = vmul.f32 %v2967_v32, %v804_v50  ;;  %1996 = vrcp.f32 %v745_v3  ;;  %v2670_v33 = vsel %vm933_vm3, %v988_v53, %v992_v2  ;;  %v1987_v23 = vpop.eup %1986  ;;  %1803 = vmatpush3.bf16.xpose.msra.mxu1 %v1428_v51  ;;  %v2707_v60 = vld [vmem:[%s2467_s20 + $0x6c] sm:$0xff]  }
 0x180   : > { %v1096_v37 = vrot.slane %v916_v1, 1  ;;  %v895_v39 = vmul.f32 %v2968_v25, %v805_v54  ;;  %v939_v10 = vrot.slane %v937_v43, 1  ;;  %v942_v41 = vshll.u32 %v2565_v29, 16  ;;  %1194 = vst.msk [vmem:[#allocation2 + $0x50] sm:$0xff] %vm483_vm0, %v2670_v33  ;;  %v1989_v5 = vpop.eup %1988  ;;  %v748_v57 = vpop.xlane.xlu1 %747 }
 0x181   : > { %1203 = vrot.lane.b32.xlu0 %v1085_v45, %s2046_s23  ;;  %v1002_v14 = vshll.u32 %v916_v1, 16  ;;  %v2683_v42 = vpack.c.bf16 %v894_v7, %v893_v56  ;;  %v806_v35 = vmul.f32 %v1987_v23, %v2422_v44  ;;  %v751_v31 = vpop.xlane.xlu0 %750  ;;  %v1000_v45 = vor.u32 %v999_v28, %v995_v55  ;;  %v1348_v26 = vld [vmem:[#allocation2 + $0x40] sm:$0xff] }
 0x182   : > { %v2681_v15 = vsel %vm1079_vm2, %v1095_v34, %v1096_v37  ;;  %v918_v43 = vpack.c.bf16 %v895_v39, %v895_v39  ;;  %v807_v29 = vmul.f32 %v1989_v5, %v2430_v49  ;;  %1998 = vrcp.f32 %v748_v57  ;;  %1822 = vmatprep.subr.msk.bf16.mxu1 %vm483_vm0, %v1348_v26  ;;  %1108 = vrot.lane.b32.xlu1 %v2585_v40, %s2044_s21 }
 0x183   : > { %1327 = vst.msk [vmem:[#allocation2 + $0x58] sm:$0xff] %vm483_vm0, %v2681_v15  ;;  %v1004_v0 = vrot.slane %v1002_v14, 1  ;;  %931 = vst.msk [vmem:[#allocation2 + $0x90] sm:$0xff] %vm483_vm0, %v2683_v42  ;;  %v1098_v48 = vrot.slane %v2683_v42, 1  ;;  %v2969_v44 = vunpack.c.l.bf16 %v2530_v58  ;;  %2000 = vrcp.f32 %v751_v31  ;;  %v1991_v27 = vpop.eup %1990 }
 0x184   : > { %v935_v49 = vshrl.u32 %v2495_v11, 16  ;;  %v1099_v52 = vrot.slane %v918_v43, 1  ;;  %v2970_v18 = vunpack.c.h.bf16 %v2530_v58  ;;  %v944_v34 = vrot.slane %v942_v41, 1  ;;  %v1993_v56 = vpop.eup %1992  ;;  %v754_v63 = vpop.xlane.xlu1 %753 }
 0x185   : > { %v896_v21 = vmul.f32 %v2969_v44, %v806_v35  ;;  %1205 = vrot.lane.b32.xlu0 %v2585_v40, %s2046_s23  ;;  %v2703_v12 = vsel %vm933_vm3, %v1000_v45, %v1004_v0  ;;  %v808_v2 = vmul.f32 %v1991_v27, %v2432_v36  ;;  %v1009_v11 = vshll.u32 %v2683_v42, 16  ;;  %v844_v45 = vld [vmem:[%s2467_s20 + $0x74] sm:$0x1] }
 0x186   : > { %v897_v17 = vmul.f32 %v2970_v18, %v807_v29  ;;  %v940_v1 = vor.u32 %v939_v10, %v935_v49  ;;  %1195 = vst.msk [vmem:[#allocation2 + $0x68] sm:$0xff] %vm483_vm0, %v2703_v12  ;;  %v1014_v58 = vshll.u32 %v918_v43, 16  ;;  %v2713_v50 = vsel %vm1079_vm2, %v1098_v48, %v1099_v52  ;;  %1110 = vrot.lane.b32.xlu1 %v2619_v8, %s2044_s21 }
 0x187   : > { %v809_v9 = vmul.f32 %v1993_v56, %v2438_v62  ;;  %2002 = vrcp.f32 %v754_v63  ;;  %1328 = vst.msk [vmem:[#allocation2 + $0x70] sm:$0xff] %vm483_vm0, %v2713_v50  ;;  %v2971_v36 = vunpack.c.l.bf16 %v2539_v61  ;;  %v1431_v13 = vsel %vm483_vm0, %v1348_v26, 0 }
 0x188   : > { %v2715_v40 = vpack.c.bf16 %v897_v17, %v896_v21  ;;  %v1007_v53 = vshrl.u32 %v2683_v42, 16  ;;  %v1011_v55 = vrot.slane %v1009_v11, 1  ;;  %v1995_v54 = vpop.eup %1994  ;;  %v872_v62 = vunpack.c.l.bf16 %v2707_v60  ;;  %1805 = vmatpush3.bf16.xpose.msra.mxu1 %v1431_v13 }
 0x189   : > { %v898_v3 = vmul.f32 %v2971_v36, %v808_v2  ;;  %1207 = vrot.lane.b32.xlu0 %v2619_v8, %s2046_s23  ;;  %v945_v61 = vsel %vm933_vm3, %v940_v1, %v944_v34  ;;  %v1016_v51 = vrot.slane %v1014_v58, 1  ;;  %v1997_v37 = vpop.eup %1996  ;;  %v810_v23 = vmul.f32 %v1995_v54, %v2440_v16 }
 0x18a   : > { %932 = vst.msk [vmem:[#allocation2 + $0xa8] sm:$0xff] %vm483_vm0, %v2715_v40  ;;  %v1021_v28 = vshll.u32 %v2715_v40, 16  ;;  %v1101_v7 = vrot.slane %v2715_v40, 1  ;;  %v1351_v25 = vld [vmem:[#allocation2 + $0x58] sm:$0xff]  ;;  %v1012_v39 = vor.u32 %v1011_v55, %v1007_v53  ;;  %v2972_v10 = vunpack.c.l.bf16 %v2544_v30  ;;  %1030 = vrot.lane.b32.xlu1 %v945_v61, %s2046_s23 }
 0x18b   : > { %v920_v32 = vpack.c.bf16 %v898_v3, %v898_v3  ;;  %v811_v14 = vmul.f32 %v1997_v37, %v2446_v4  ;;  %1823 = vmatprep.subr.msk.bf16.mxu1 %vm483_vm0, %v1351_v25  ;;  %v1019_v8 = vshrl.u32 %v2715_v40, 16  ;;  %v2973_v57 = vunpack.c.h.bf16 %v2544_v30 }
 0x18c   : > { %v899_v41 = vmul.f32 %v2972_v10, %v809_v9  ;;  %v1023_v5 = vrot.slane %v1021_v28, 1  ;;  %v2745_v16 = vsel %vm933_vm3, %v1012_v39, %v1016_v51  ;;  %v1999_v29 = vpop.eup %1998  ;;  %v2974_v26 = vunpack.c.l.bf16 %v2549_v47 }
 0x18d   : > { %v1102_v35 = vrot.slane %v920_v32, 1  ;;  %v900_v31 = vmul.f32 %v2973_v57, %v810_v23  ;;  %v1026_v43 = vshll.u32 %v920_v32, 16  ;;  %v873_v0 = vunpack.c.h.bf16 %v2707_v60  ;;  %1209 = vrot.lane.b32.xlu0 %v2643_v20, %s2046_s23  ;;  %1196 = vst.msk [vmem:[#allocation2 + $0x80] sm:$0xff] %vm483_vm0, %v2745_v16  ;;  %v2001_v48 = vpop.eup %2000  ;;  %v1367_v57 = vld [vmem:[%s2960_s5 + $0x18] sm:$0xff] }
 0x18e   : > { %v901_v4 = vmul.f32 %v2974_v26, %v811_v14  ;;  %v1024_v30 = vor.u32 %v1023_v5, %v1019_v8  ;;  %v812_v49 = vmul.f32 %v1999_v29, %v2448_v6  ;;  %v813_v52 = vmul.f32 %v2001_v48, %v2454_v46  ;;  %1112 = vrot.lane.b32.xlu1 %v2643_v20, %s2044_s21  ;;  %v1354_v46 = vld [vmem:[#allocation2 + $0x70] sm:$0xff]  ;;  %v1364_v14 = vld [vmem:[%s2960_s5] sm:$0xff] }
 0x18f   : > { %v2755_v44 = vsel %vm1079_vm2, %v1101_v7, %v1102_v35  ;;  %v2757_v21 = vpack.c.bf16 %v900_v31, %v899_v41  ;;  %v1028_v27 = vrot.slane %v1026_v43, 1  ;;  %v874_v18 = vunpack.c.l.bf16 %v844_v45  ;;  %v1366_v35 = vld [vmem:[%s2960_s5 + $0x10] sm:$0xff]  ;;  %v1739_v31 = vld [vmem:[#allocation3] ss:$0 sm:$0xff] }
 0x190   : > { %1329 = vst.msk [vmem:[#allocation2 + $0x88] sm:$0xff] %vm483_vm0, %v2755_v44  ;;  %v922_v47 = vpack.c.bf16 %v901_v4, %v901_v4  ;;  %v902_v34 = vmul.f32 %v872_v62, %v812_v49  ;;  %v1434_v56 = vsel %vm483_vm0, %v1351_v25, 0  ;;  %v903_v63 = vmul.f32 %v873_v0, %v813_v52 }
 0x191   : > { %v1200_v17 = vrot.slane %v2757_v21, 1  ;;  %v2768_v2 = vsel %vm933_vm3, %v1024_v30, %v1028_v27  ;;  %v2003_v6 = vpop.eup %2002  ;;  %1211 = vrot.lane.b32.xlu0 %v2681_v15, %s2046_s23  ;;  %1807 = vmatpush3.bf16.xpose.msra.mxu1 %v1434_v56  ;;  %v1174_v1 = vshll.u32 %v2757_v21, 16  ;;  %v1172_v36 = vshrl.u32 %v2757_v21, 16 }
 0x192   : > { %v1201_v60 = vrot.slane %v922_v47, 1  ;;  %1197 = vst.msk [vmem:[#allocation2 + $0x98] sm:$0xff] %vm483_vm0, %v2768_v2  ;;  %v814_v20 = vmul.f32 %v2003_v6, %v2456_v19  ;;  %1824 = vmatprep.subr.msk.bf16.mxu1 %vm483_vm0, %v1354_v46  ;;  %v1179_v11 = vshll.u32 %v922_v47, 16  ;;  %v923_v9 = vpack.c.bf16 %v903_v63, %v902_v34  ;;  %1032 = vrot.lane.b32.xlu1 %v2593_v24, %s2046_s23 }
 0x193   : > { %v1176_v3 = vrot.slane %v1174_v1, 1  ;;  %v1437_v62 = vsel %vm483_vm0, %v1354_v46, 0  ;;  %v2047_v8 = vmov 0  }
 0x194   : > { %v1202_v58 = vsel %vm1079_vm2, %v1200_v17, %v1201_v60  ;;  %v904_v13 = vmul.f32 %v874_v18, %v814_v20  ;;  %v1181_v19 = vrot.slane %v1179_v11, 1  ;;  %v1271_v55 = vshll.u32 %v923_v9, 16  ;;  %1875 = vset.pattern.permute.xlu1 %v2047_v8  ;;  %1874 = vset.pattern.permute.xlu0 %v2047_v8 }
 0x195   : > { %1330 = vst.msk [vmem:[#allocation2 + $0xa0] sm:$0xff] %vm483_vm0, %v1202_v58  ;;  %1280 = vrot.lane.b32.xlu0 %v2605_v59, %s2045_s22  ;;  %v1177_v53 = vor.u32 %v1176_v3, %v1172_v36  ;;  %v1313_v28 = vrot.slane %v923_v9, 1  ;;  %v1269_v24 = vshrl.u32 %v923_v9, 16 }
 0x196   : > { %v924_v54 = vpack.c.bf16 %v904_v13, %v904_v13  ;;  %v1273_v51 = vrot.slane %v1271_v55, 1  ;;  %1146 = vrot.lane.b32.xlu1 %v2645_v38, %s2045_s22 }
 0x197   : > { %v1182_v61 = vsel %vm933_vm3, %v1177_v53, %v1181_v19  ;;  %v1357_v7 = vld [vmem:[#allocation2 + $0x88] sm:$0xff] }
 0x198   : > { %v1314_v37 = vrot.slane %v924_v54, 1  ;;  %1198 = vst.msk [vmem:[#allocation2 + $0xb0] sm:$0xff] %vm483_vm0, %v1182_v61  ;;  %v1276_v32 = vshll.u32 %v924_v54, 16  ;;  %v1274_v25 = vor.u32 %v1273_v51, %v1269_v24  ;;  %v1440_v10 = vsel %vm483_vm0, %v1357_v7, 0 }
 0x199   : > { %1244 = vrot.lane.b32.xlu0 %v2683_v42, %s2044_s21  ;;  %1809 = vmatpush3.bf16.xpose.msra.mxu1 %v1437_v62 }
 0x19a   : > { %v1315_v23 = vsel %vm1079_vm2, %v1313_v28, %v1314_v37  ;;  %1825 = vmatprep.subr.msk.bf16.mxu1 %vm483_vm0, %v1357_v7  ;;  %v1278_v39 = vrot.slane %v1276_v32, 1  ;;  %1034 = vrot.lane.b32.xlu1 %v2605_v59, %s2046_s23 }
 0x19b   : > { %1331 = vst.msk [vmem:[#allocation2 + $0xb8] sm:$0xff] %vm483_vm0, %v1315_v23 }
 0x19c   : > { %v1279_v38 = vsel %vm933_vm3, %v1274_v25, %v1278_v39  ;;  %v1360_v41 = vld [vmem:[#allocation2 + $0xa0] sm:$0xff] }
 0x19d   : > { %1282 = vrot.lane.b32.xlu0 %v2636_v22, %s2045_s22  ;;  %v1443_v59 = vsel %vm483_vm0, %v1360_v41, 0 }
 0x19e   : > { %1114 = vrot.lane.b32.xlu1 %v2681_v15, %s2044_s21 }
 0x1a1   : > { %1213 = vrot.lane.b32.xlu0 %v2713_v50, %s2046_s23  ;;  %1811 = vmatpush3.bf16.xpose.msra.mxu1 %v1440_v10 }
 0x1a2   : > { %1826 = vmatprep.subr.msk.bf16.mxu1 %vm483_vm0, %v1360_v41  ;;  %1036 = vrot.lane.b32.xlu1 %v2636_v22, %s2046_s23  ;;  %v1363_v15 = vld [vmem:[#allocation2 + $0xb8] sm:$0xff] }
 0x1a3   : > { %v1446_v22 = vsel %vm483_vm0, %v1363_v15, 0 }
 0x1a5   : > { %1284 = vrot.lane.b32.xlu0 %v2670_v33, %s2045_s22 }
 0x1a6   : > { %1148 = vrot.lane.b32.xlu1 %v2683_v42, %s2045_s22  ;;  %v1879_v42 = vld [vmem:[%s2959_s4 + $0x8] ss:$12 sps:$4 sm:$0xff]  }
 0x1a7   : > { %1816 = vmatprep.mubr.msk.bf16.mxu1 %vm483_vm0, %v1879_v42 }
 0x1a9   : > { %1246 = vrot.lane.b32.xlu0 %v2715_v40, %s2044_s21  ;;  %1813 = vmatpush3.bf16.xpose.msra.mxu1 %v1443_v59 }
 0x1aa   : > { %1827 = vmatprep.subr.msk.bf16.mxu1 %vm483_vm0, %v1363_v15  ;;  %1038 = vrot.lane.b32.xlu1 %v2670_v33, %s2046_s23  ;;  %v1878_v33 = vld [vmem:[%s2959_s4 + $0x4] ss:$12 sps:$4 sm:$0xff]  }
 0x1ab   : > { %1480 = vmatprep.mubr.bf16.mxu0 %v1878_v33 }
 0x1ad   : > { %1286 = vrot.lane.b32.xlu0 %v2703_v12, %s2045_s22 }
 0x1ae   : > { %1116 = vrot.lane.b32.xlu1 %v2713_v50, %s2044_s21 }
 0x1b1   : > { %1215 = vrot.lane.b32.xlu0 %v2755_v44, %s2046_s23  ;;  %1815 = vmatpush3.bf16.xpose.msra.mxu1 %v1446_v22 }
 0x1b2   : > { %1040 = vrot.lane.b32.xlu1 %v2703_v12, %s2046_s23  ;;  %v1880_v12 = vld [vmem:[%s2959_s4 + $0x20] ss:$12 sps:$4 sm:$0xff]  }
 0x1b5   : > { %1288 = vrot.lane.b32.xlu0 %v2745_v16, %s2045_s22 }
 0x1b6   : > { %1150 = vrot.lane.b32.xlu1 %v2715_v40, %s2045_s22  ;;  %v1365_v40 = vld [vmem:[%s2960_s5 + $0x8] sm:$0xff] }
 0x1b8   : > { %1817 = vmatmul.mubr.msk.bf16.vlgmr.msra.gmra.mrb[0].mxu1 %vm483_vm0, %v1880_v12 }
 0x1b9   : > { %1248 = vrot.lane.b32.xlu0 %v2757_v21, %s2044_s21 }
 0x1ba   : > { %1042 = vrot.lane.b32.xlu1 %v2745_v16, %s2046_s23 }
 0x1bd   : > { %1290 = vrot.lane.b32.xlu0 %v2768_v2, %s2045_s22 }
 0x1be   : > { %1118 = vrot.lane.b32.xlu1 %v2755_v44, %s2044_s21 }
 0x1c1   : > { %1217 = vrot.lane.b32.xlu0 %v1202_v58, %s2046_s23 }
 0x1c2   : > { %1044 = vrot.lane.b32.xlu1 %v2768_v2, %s2046_s23 }
 0x1c5   : > { %1292 = vrot.lane.b32.xlu0 %v1182_v61, %s2045_s22 }
 0x1c6   : > { %1152 = vrot.lane.b32.xlu1 %v2757_v21, %s2045_s22 }
 0x1c9   : > { %1250 = vrot.lane.b32.xlu0 %v923_v9, %s2044_s21 }
 0x1ca   : > { %1375 = vperm.xlu1 %1875, %v1365_v40  }
 0x1cd   : > { %1294 = vrot.lane.b32.xlu0 %v1279_v38, %s2045_s22 }
 0x1ce   : > { %1380 = vperm.xlu1 %1875, %v1366_v35  }
 0x1d1   : > { %1370 = vperm.xlu0 %1874, %v1364_v14  }
 0x1d2   : > { %1557 = vperm.xlu1 %1875, %v1739_v31   ;;  %v1881_v31 = vld [vmem:[%s2959_s4 + $0x1c] ss:$12 sps:$4 sm:$0xff]  }
 0x1d4   : > { %v1237_v50 = vpop.permute.xlu1 %1236 }
 0x1d5   : > { %1385 = vperm.xlu0 %1874, %v1367_v57   ;;  %v1876_v57 = vld [vmem:[%s2959_s4] ss:$12 sps:$4 sm:$0xff]  }
 0x1d9   : > { %v1139_v5 = vpop.permute.xlu1 %1138 }
 0x1dd   : > { %v1141_v45 = vpop.permute.xlu1 %1140 }
 0x1e1   : > { %v1143_v16 = vpop.permute.xlu1 %1142  ;;  %v1239_v43 = vpop.permute.xlu0 %1238 }
 0x1e8   : > { %v1145_v29 = vpop.permute.xlu1 %1144 }
 0x1e9   : > { %v1241_v26 = vpop.permute.xlu0 %1240 }
 0x1ec   : > { %v1105_v4 = vpop.permute.xlu1 %1104 }
 0x1ef   : > { %v1243_v0 = vpop.permute.xlu0 %1242 }
 0x1f0   : > { %v1107_v30 = vpop.permute.xlu1 %1106 }
 0x1f3   : > { %v1204_v48 = vpop.permute.xlu0 %1203 }
 0x1f4   : > { %1227 = vst.msk [vmem:[#allocation2 + $0x8] sm:$0xff] %vm1054_vm4, %v1204_v48  ;;  %v1109_v44 = vpop.permute.xlu1 %1108 }
 0x1f5   : > { %1260 = vst.msk [vmem:[#allocation2 + $0x8] sm:$0xff] %vm1128_vm5, %v1237_v50 }
 0x1f7   : > { %v1206_v21 = vpop.permute.xlu0 %1205 }
 0x1f8   : > { %1228 = vst.msk [vmem:[#allocation2 + $0x20] sm:$0xff] %vm1054_vm4, %v1206_v21  ;;  %v1111_v49 = vpop.permute.xlu1 %1110 }
 0x1f9   : > { %1261 = vst.msk [vmem:[#allocation2 + $0x20] sm:$0xff] %vm1128_vm5, %v1239_v43 }
 0x1fb   : > { %v1208_v27 = vpop.permute.xlu0 %1207 }
 0x1fc   : > { %1229 = vst.msk [vmem:[#allocation2 + $0x38] sm:$0xff] %vm1054_vm4, %v1208_v27  ;;  %v1031_v47 = vpop.permute.xlu1 %1030 }
 0x1fd   : > { %1262 = vst.msk [vmem:[#allocation2 + $0x38] sm:$0xff] %vm1128_vm5, %v1241_v26 }
 0x1fe   : > { %1055 = vst.msk [vmem:[#allocation2] sm:$0xff] %vm1054_vm4, %v1031_v47 }
 0x1ff   : > { %v1210_v52 = vpop.permute.xlu0 %1209  ;;  %1129 = vst.msk [vmem:[#allocation2] sm:$0xff] %vm1128_vm5, %v1105_v4 }
 0x200   : > { %1230 = vst.msk [vmem:[#allocation2 + $0x50] sm:$0xff] %vm1054_vm4, %v1210_v52  ;;  %v1113_v18 = vpop.permute.xlu1 %1112 }
 0x201   : > { %1163 = vst.msk [vmem:[#allocation2] sm:$0xff] %vm1162_vm6, %v1139_v5 }
 0x202   : > { %1263 = vst.msk [vmem:[#allocation2 + $0x50] sm:$0xff] %vm1128_vm5, %v1243_v0 }
 0x203   : > { %v1212_v17 = vpop.permute.xlu0 %1211 }
 0x204   : > { %1231 = vst.msk [vmem:[#allocation2 + $0x68] sm:$0xff] %vm1054_vm4, %v1212_v17  ;;  %v1033_v34 = vpop.permute.xlu1 %1032  ;;  %v1568_v17 = vld [vmem:[%s2931_s16] sm:$0xff] }
 0x205   : > { %1056 = vst.msk [vmem:[#allocation2 + $0x18] sm:$0xff] %vm1054_vm4, %v1033_v34 }
 0x206   : > { %1130 = vst.msk [vmem:[#allocation2 + $0x18] sm:$0xff] %vm1128_vm5, %v1107_v30 }
 0x207   : > { %v1281_v56 = vpop.permute.xlu0 %1280  ;;  %1164 = vst.msk [vmem:[#allocation2 + $0x18] sm:$0xff] %vm1162_vm6, %v1141_v45  ;;  %v1883_v45 = vld [vmem:[%s2959_s4 + $0x18] ss:$12 sps:$4 sm:$0xff]  }
 0x208   : > { %1304 = vst.msk [vmem:[#allocation2 + $0x8] sm:$0xff] %vm1162_vm6, %v1281_v56  ;;  %v1147_v2 = vpop.permute.xlu1 %1146  ;;  %v1340_v1 = vld [vmem:[#allocation2] sm:$0xff] }
 0x20b   : > { %v1245_v6 = vpop.permute.xlu0 %1244 }
 0x20c   : > { %1264 = vst.msk [vmem:[#allocation2 + $0x68] sm:$0xff] %vm1128_vm5, %v1245_v6  ;;  %v1035_v60 = vpop.permute.xlu1 %1034 }
 0x20d   : > { %1057 = vst.msk [vmem:[#allocation2 + $0x30] sm:$0xff] %vm1054_vm4, %v1035_v60  ;;  %v1569_v60 = vld [vmem:[%s2931_s16 + $0x8] sm:$0xff] }
 0x20e   : > { %1131 = vst.msk [vmem:[#allocation2 + $0x30] sm:$0xff] %vm1128_vm5, %v1109_v44  ;;  %v1343_v3 = vld [vmem:[#allocation2 + $0x18] sm:$0xff] }
 0x20f   : > { %v1283_v63 = vpop.permute.xlu0 %1282  ;;  %v1341_v46 = vld [vmem:[#allocation2 + $0x8] sm:$0xff]  ;;  %1165 = vst.msk [vmem:[#allocation2 + $0x30] sm:$0xff] %vm1162_vm6, %v1143_v16 }
 0x210   : > { %1305 = vst.msk [vmem:[#allocation2 + $0x20] sm:$0xff] %vm1162_vm6, %v1283_v63  ;;  %1448 = vmatprep.subr.bf16.mxu0 %v1341_v46  ;;  %v1115_v20 = vpop.permute.xlu1 %1114 }
 0x211   : > { %1449 = vmatpush1.bf16.xpose.msra.mxu0 %v1340_v1 }
 0x213   : > { %v1214_v11 = vpop.permute.xlu0 %1213 }
 0x214   : > { %1232 = vst.msk [vmem:[#allocation2 + $0x80] sm:$0xff] %vm1054_vm4, %v1214_v11  ;;  %v1037_v58 = vpop.permute.xlu1 %1036 }
 0x215   : > { %1058 = vst.msk [vmem:[#allocation2 + $0x48] sm:$0xff] %vm1054_vm4, %v1037_v58 }
 0x216   : > { %1132 = vst.msk [vmem:[#allocation2 + $0x48] sm:$0xff] %vm1128_vm5, %v1111_v49  ;;  %v1346_v62 = vld [vmem:[#allocation2 + $0x30] sm:$0xff] }
 0x217   : > { %v1285_v9 = vpop.permute.xlu0 %1284  ;;  %v1344_v36 = vld [vmem:[#allocation2 + $0x20] sm:$0xff]  ;;  %1166 = vst.msk [vmem:[#allocation2 + $0x48] sm:$0xff] %vm1162_vm6, %v1145_v29 }
 0x218   : > { %1306 = vst.msk [vmem:[#allocation2 + $0x38] sm:$0xff] %vm1162_vm6, %v1285_v9  ;;  %1450 = vmatprep.subr.bf16.mxu0 %v1344_v36  ;;  %v1149_v13 = vpop.permute.xlu1 %1148 }
 0x219   : > { %1451 = vmatpush1.bf16.xpose.msra.mxu0 %v1343_v3 }
 0x21b   : > { %v1247_v53 = vpop.permute.xlu0 %1246 }
 0x21c   : > { %1265 = vst.msk [vmem:[#allocation2 + $0x80] sm:$0xff] %vm1128_vm5, %v1247_v53  ;;  %v1039_v19 = vpop.permute.xlu1 %1038 }
 0x21d   : > { %1059 = vst.msk [vmem:[#allocation2 + $0x60] sm:$0xff] %vm1054_vm4, %v1039_v19 }
 0x21e   : > { %1133 = vst.msk [vmem:[#allocation2 + $0x60] sm:$0xff] %vm1128_vm5, %v1113_v18  ;;  %v1349_v32 = vld [vmem:[#allocation2 + $0x48] sm:$0xff] }
 0x21f   : > { %v1287_v55 = vpop.permute.xlu0 %1286  ;;  %v1347_v54 = vld [vmem:[#allocation2 + $0x38] sm:$0xff]  ;;  %1167 = vst.msk [vmem:[#allocation2 + $0x60] sm:$0xff] %vm1162_vm6, %v1147_v2 }
 0x220   : > { %1307 = vst.msk [vmem:[#allocation2 + $0x50] sm:$0xff] %vm1162_vm6, %v1287_v55  ;;  %1452 = vmatprep.subr.bf16.mxu0 %v1347_v54  ;;  %v1117_v61 = vpop.permute.xlu1 %1116  ;;  %v1570_v55 = vld [vmem:[%s2931_s16 + $0x10] sm:$0xff] }
 0x221   : > { %1453 = vmatpush1.bf16.xpose.msra.mxu0 %v1346_v62 }
 0x223   : > { %v1216_v51 = vpop.permute.xlu0 %1215 }
 0x224   : > { %1233 = vst.msk [vmem:[#allocation2 + $0x98] sm:$0xff] %vm1054_vm4, %v1216_v51  ;;  %v1041_v28 = vpop.permute.xlu1 %1040  ;;  %v1571_v51 = vld [vmem:[%s2931_s16 + $0x18] sm:$0xff] }
 0x225   : > { %1060 = vst.msk [vmem:[#allocation2 + $0x78] sm:$0xff] %vm1054_vm4, %v1041_v28 }
 0x226   : > { %1134 = vst.msk [vmem:[#allocation2 + $0x78] sm:$0xff] %vm1128_vm5, %v1115_v20  ;;  %v1352_v10 = vld [vmem:[#allocation2 + $0x60] sm:$0xff] }
 0x227   : > { %v1289_v37 = vpop.permute.xlu0 %1288  ;;  %v1350_v24 = vld [vmem:[#allocation2 + $0x50] sm:$0xff]  ;;  %1168 = vst.msk [vmem:[#allocation2 + $0x78] sm:$0xff] %vm1162_vm6, %v1149_v13 }
 0x228   : > { %1308 = vst.msk [vmem:[#allocation2 + $0x68] sm:$0xff] %vm1162_vm6, %v1289_v37  ;;  %1454 = vmatprep.subr.bf16.mxu0 %v1350_v24  ;;  %v1151_v7 = vpop.permute.xlu1 %1150 }
 0x229   : > { %1455 = vmatpush1.bf16.xpose.msra.mxu0 %v1349_v32 }
 0x22b   : > { %v1249_v23 = vpop.permute.xlu0 %1248 }
 0x22c   : > { %1266 = vst.msk [vmem:[#allocation2 + $0x98] sm:$0xff] %vm1128_vm5, %v1249_v23  ;;  %v1043_v25 = vpop.permute.xlu1 %1042 }
 0x22d   : > { %1061 = vst.msk [vmem:[#allocation2 + $0x90] sm:$0xff] %vm1054_vm4, %v1043_v25 }
 0x22e   : > { %1135 = vst.msk [vmem:[#allocation2 + $0x90] sm:$0xff] %vm1128_vm5, %v1117_v61  ;;  %v1355_v42 = vld [vmem:[#allocation2 + $0x78] sm:$0xff] }
 0x22f   : > { %v1291_v39 = vpop.permute.xlu0 %1290  ;;  %v1353_v38 = vld [vmem:[#allocation2 + $0x68] sm:$0xff]  ;;  %1169 = vst.msk [vmem:[#allocation2 + $0x90] sm:$0xff] %vm1162_vm6, %v1151_v7 }
 0x230   : > { %1309 = vst.msk [vmem:[#allocation2 + $0x80] sm:$0xff] %vm1162_vm6, %v1291_v39  ;;  %1456 = vmatprep.subr.bf16.mxu0 %v1353_v38  ;;  %v1119_v41 = vpop.permute.xlu1 %1118 }
 0x231   : > { %1457 = vmatpush1.bf16.xpose.msra.mxu0 %v1352_v10 }
 0x233   : > { %v1218_v59 = vpop.permute.xlu0 %1217 }
 0x234   : > { %1234 = vst.msk [vmem:[#allocation2 + $0xb0] sm:$0xff] %vm1054_vm4, %v1218_v59  ;;  %v1045_v15 = vpop.permute.xlu1 %1044 }
 0x235   : > { %1062 = vst.msk [vmem:[#allocation2 + $0xa8] sm:$0xff] %vm1054_vm4, %v1045_v15 }
 0x236   : > { %1136 = vst.msk [vmem:[#allocation2 + $0xa8] sm:$0xff] %vm1128_vm5, %v1119_v41  ;;  %v1358_v8 = vld [vmem:[#allocation2 + $0x90] sm:$0xff] }
 0x237   : > { %v1293_v22 = vpop.permute.xlu0 %1292  ;;  %v1356_v33 = vld [vmem:[#allocation2 + $0x80] sm:$0xff] }
 0x238   : > { %1310 = vst.msk [vmem:[#allocation2 + $0x98] sm:$0xff] %vm1162_vm6, %v1293_v22  ;;  %1458 = vmatprep.subr.bf16.mxu0 %v1356_v33  ;;  %v1153_v12 = vpop.permute.xlu1 %1152 }
 0x239   : > { %1459 = vmatpush1.bf16.xpose.msra.mxu0 %v1355_v42  ;;  %1170 = vst.msk [vmem:[#allocation2 + $0xa8] sm:$0xff] %vm1162_vm6, %v1153_v12 }
 0x23b   : > { %v1251_v50 = vpop.permute.xlu0 %1250 }
 0x23c   : > { %1267 = vst.msk [vmem:[#allocation2 + $0xb0] sm:$0xff] %vm1128_vm5, %v1251_v50 }
 0x23f   : > { %v1295_v40 = vpop.permute.xlu0 %1294  ;;  %v1359_v14 = vld [vmem:[#allocation2 + $0x98] sm:$0xff] }
 0x240   : > { %1311 = vst.msk [vmem:[#allocation2 + $0xb0] sm:$0xff] %vm1162_vm6, %v1295_v40  ;;  %1460 = vmatprep.subr.bf16.mxu0 %v1359_v14  ;;  %v1361_v35 = vld [vmem:[#allocation2 + $0xa8] sm:$0xff] }
 0x241   : > { %1461 = vmatpush1.bf16.xpose.msra.mxu0 %v1358_v8 }
 0x247   : > { %v1362_v5 = vld [vmem:[#allocation2 + $0xb0] sm:$0xff] }
 0x248   : > { %1462 = vmatprep.subr.bf16.mxu0 %v1362_v5 }
 0x249   : > { %1463 = vmatpush1.bf16.xpose.msra.mxu0 %v1361_v35  ;;  %v1376_v4 = vpop.permute.xlu1 %1375 }
 0x24d   : > { %v1381_v0 = vpop.permute.xlu1 %1380 }
 0x250   : > { %1481 = vmatmul.mubr.bf16.vlgmr.msra.gmra.mrb[0].mxu0 %v1876_v57  ;;  %v1371_v30 = vpop.permute.xlu0 %1370 }
 0x251   : > { %1488 = vmatprep.mubr.bf16.mxu0 %v1881_v31  ;;  %v1558_v27 = vpop.permute.xlu1 %1557 }
 0x254   : > { %v1386_v9 = vpop.permute.xlu0 %1385 }
 0x258   : > { %1489 = vmatmul.mubr.bf16.gmra.mrb[4].mxu0 %v1883_v45 }
 0x28b   : > { %v1818_v16 = vpop.f32.mrb[0].mxu1 }
 0x28c   : > { %v1531_v43 = vpop.f32.mrb[1].mxu1 }
 0x28d   : > { %v1819_v29 = vpop.f32.mrb[2].mxu1 }
 0x28e   : > { %v1534_v26 = vpop.f32.mrb[3].mxu1 }
 0x323   : > { %v1482_v48 = vpop.f32.mrb[0].mxu0 }
 0x324   : > { %v1483_v44 = vadd.f32 %v1482_v48, %v1371_v30  ;;  %v1484_v21 = vpop.f32.mrb[1].mxu0 }
 0x325   : > { %v1485_v49 = vpop.f32.mrb[2].mxu0 }
 0x326   : > { %v1486_v47 = vadd.f32 %v1485_v49, %v1376_v4  ;;  %v1532_v52 = vadd.f32 %v1531_v43, %v1483_v44  ;;  %v1487_v18 = vpop.f32.mrb[3].mxu0 }
 0x328   : > { %vm1547_vm7 = vcmp.ge.f32.partialorder %v1532_v52, 0.0  ;;  %v1560_v34 = vmul.f32 %v1558_v27, %v1532_v52  ;;  %v1535_v56 = vadd.f32 %v1534_v26, %v1486_v47 }
 0x32a   : > { %v1564_v2 = vsel %vm1547_vm7, %v1532_v52, %v1560_v34  ;;  %vm1548_vm8 = vcmp.ge.f32.partialorder %v1535_v56, 0.0  ;;  %v1561_v6 = vmul.f32 %v1558_v27, %v1535_v56 }
 0x32b   : > { %v1572_v63 = vadd.f32 %v1568_v17, %v1564_v2  ;;  %v1490_v46 = vpop.f32.mrb[4].mxu0 }
 0x32c   : > { %v1565_v1 = vsel %vm1548_vm8, %v1535_v56, %v1561_v6  ;;  %v1491_v20 = vadd.f32 %v1490_v46, %v1381_v0  ;;  %v1492_v11 = vpop.f32.mrb[5].mxu0 }
 0x32d   : > { %1576 = vst [vmem:[%s384_s17] sm:$0xff] %v1572_v63  ;;  %v1573_v58 = vadd.f32 %v1569_v60, %v1565_v1  ;;  %v1493_v36 = vpop.f32.mrb[6].mxu0 }
 0x32e   : > { %v1540_v3 = vadd.f32 %v1818_v16, %v1491_v20  ;;  %v1494_v13 = vadd.f32 %v1493_v36, %v1386_v9  ;;  %v1495_v53 = vpop.f32.mrb[7].mxu0 }
 0x32f   : > { %1577 = vst [vmem:[%s384_s17 + $0x8] sm:$0xff] %v1573_v58 }
 0x330   : > { %vm1549_vm9 = vcmp.ge.f32.partialorder %v1540_v3, 0.0  ;;  %v1562_v19 = vmul.f32 %v1558_v27, %v1540_v3  ;;  %v1543_v54 = vadd.f32 %v1819_v29, %v1494_v13 }
 0x332   : > { %v1566_v62 = vsel %vm1549_vm9, %v1540_v3, %v1562_v19  ;;  %vm1550_vm10 = vcmp.ge.f32.partialorder %v1543_v54, 0.0  ;;  %v1563_v61 = vmul.f32 %v1558_v27, %v1543_v54 }
 0x333   : > { %v1574_v28 = vadd.f32 %v1570_v55, %v1566_v62 }
 0x334   : > { %v1567_v37 = vsel %vm1550_vm10, %v1543_v54, %v1563_v61 }
 0x335   : > { %1578 = vst [vmem:[%s384_s17 + $0x10] sm:$0xff] %v1574_v28  ;;  %v1575_v24 = vadd.f32 %v1571_v51, %v1567_v37 }
 0x337   : > { %1579 = vst [vmem:[%s384_s17 + $0x18] sm:$0xff] %v1575_v24 }
 0x338 PF: > { %s19_s30 = sadd.s32 1, %s2042_s30   ;;  %s2975_s26 = smov %s2034_s28 }
 0x339   : > { %p16_p7 = scmp.ge.s32.totalorder %s19_s30, 6   ;;  %s2976_s27 = smov %s2038_s29 }
 0x33a   : > { %s2977_s28 = smov %s2980_s6  ;;  %s2978_s29 = smov %s2984_s8 }
 0x33b   :  { %18 = sbr.rel (!%p16_p7) target bundleno = 3 (0x3), region = 84 }

</bundles_post_ra>
